<compile_context>
chip_gen: v7x
topology: tpu7x:2x2x1
jax: 0.10.0
libtpu: 0.0.40
codegen_flags: <defaults>
</compile_context>

<pallas_src>
import functools

import jax
import jax.numpy as jnp
from jax.experimental import pallas as pl
from jax.experimental.pallas import tpu as pltpu

TP = 16


# ----------------------- shared attention + c_proj body -----------------------
def _attn_and_proj(x, w_proj, b_proj, *, num_heads, head_dim, split_size):
    """x: (S, 3*split_size) fused q|k|v for one batch element (f32).
    Returns (S, embed_dim): c_proj(merge_heads(softmax(mask(QK^T/sqrt(D))) @ V))."""
    S = x.shape[0]
    scale = 1.0 / float(head_dim) ** 0.5

    # causal mask (query_length == key_length, no layer_past); masked_bias = -10000.0
    row = jax.lax.broadcasted_iota(jnp.int32, (S, S), 0)
    col = jax.lax.broadcasted_iota(jnp.int32, (S, S), 1)
    causal = col <= row

    acc = None
    for h in range(num_heads):                      # static unroll (num_heads == 2)
        lo = h * head_dim
        hi = lo + head_dim
        qh = x[:, lo:hi] * scale                                # scale folded into q
        kh = x[:, split_size + lo:split_size + hi]
        vh = x[:, 2 * split_size + lo:2 * split_size + hi]

        # Q @ K^T via contraction over the shared last dim (no explicit K transpose).
        s = jax.lax.dot_general(qh, kh, (((1,), (1,)), ((), ())),
                                preferred_element_type=jnp.float32)   # (S, S)
        s = jnp.where(causal, s, jnp.float32(-10000.0))

        # softmax along last dim (f32); reciprocal on the EUP slot
        m = jnp.max(s, axis=-1, keepdims=True)
        p = jnp.exp(s - m)
        inv = pl.reciprocal(jnp.sum(p, axis=-1, keepdims=True), approx=True)
        p = p * inv

        oh = jnp.dot(p, vh, preferred_element_type=jnp.float32)      # (S, D)
        # per-head c_proj accumulation instead of concat-then-matmul
        contrib = jnp.dot(oh, w_proj[lo:hi, :], preferred_element_type=jnp.float32)
        acc = contrib if acc is None else acc + contrib

    return acc + b_proj                                               # (S, E) + (1, E)


# ------------------------------- kernel bodies --------------------------------
def _attn_proj_kernel(x_ref, wp_ref, bp_ref, o_ref, *, num_heads, head_dim, split_size):
    # module-faithful: x is the pre-projected fused QKV for one batch element
    out = _attn_and_proj(x_ref[0], wp_ref[...], bp_ref[...],
                         num_heads=num_heads, head_dim=head_dim, split_size=split_size)
    o_ref[0] = out.astype(o_ref.dtype)


def _qkv_attn_proj_kernel(h_ref, wa_ref, ba_ref, wp_ref, bp_ref, o_ref, *,
                          num_heads, head_dim, split_size):
    # fused c_attn Conv1D: (S, E) @ (E, 3*split_size) + b — K=1024 fills the MXU
    x = jnp.dot(h_ref[0], wa_ref[...], preferred_element_type=jnp.float32) + ba_ref[...]
    out = _attn_and_proj(x, wp_ref[...], bp_ref[...],
                         num_heads=num_heads, head_dim=head_dim, split_size=split_size)
    o_ref[0] = out.astype(o_ref.dtype)


# ------------------------------ forward wrappers ------------------------------
def gpt2_attention_forward(x, c_proj_w, c_proj_b, *, num_heads, head_dim):
    """Module-faithful path. x: (B, S, 3*split_size) fused QKV -> (B, S, embed_dim)."""
    B, S, three_split = x.shape
    split_size = three_split // 3
    embed_dim = c_proj_w.shape[1]
    kernel = functools.partial(_attn_proj_kernel, num_heads=num_heads,
                               head_dim=head_dim, split_size=split_size)
    return pl.pallas_call(
        kernel,
        out_shape=jax.ShapeDtypeStruct((B, S, embed_dim), x.dtype),
        grid=(B,),
        in_specs=[
            pl.BlockSpec((1, S, three_split), lambda b: (b, 0, 0)),     # per-batch x
            pl.BlockSpec((split_size, embed_dim), lambda b: (0, 0)),    # full c_proj W
            pl.BlockSpec((1, embed_dim), lambda b: (0, 0)),             # c_proj bias
        ],
        out_specs=pl.BlockSpec((1, S, embed_dim), lambda b: (b, 0, 0)),  # lane-dense
        compiler_params=pltpu.CompilerParams(
            dimension_semantics=("parallel",)),   # one batch per v7x TensorCore
    )(x, c_proj_w, c_proj_b.reshape(1, embed_dim))


def gpt2_attention_forward_fused_qkv(hidden, c_attn_w, c_attn_b, c_proj_w, c_proj_b,
                                     *, num_heads, head_dim):
    """Perf-preferred path: fuses the upstream c_attn Conv1D (QKV projection) in-kernel.
    hidden: (B, S, embed_dim) -> (B, S, embed_dim)."""
    B, S, E = hidden.shape
    three_split = c_attn_w.shape[1]
    split_size = three_split // 3
    embed_dim = c_proj_w.shape[1]
    kernel = functools.partial(_qkv_attn_proj_kernel, num_heads=num_heads,
                               head_dim=head_dim, split_size=split_size)
    return pl.pallas_call(
        kernel,
        out_shape=jax.ShapeDtypeStruct((B, S, embed_dim), hidden.dtype),
        grid=(B,),
        in_specs=[
            pl.BlockSpec((1, S, E), lambda b: (b, 0, 0)),               # per-batch hidden
            pl.BlockSpec((E, three_split), lambda b: (0, 0)),           # full c_attn W
            pl.BlockSpec((1, three_split), lambda b: (0, 0)),           # c_attn bias
            pl.BlockSpec((split_size, embed_dim), lambda b: (0, 0)),    # full c_proj W
            pl.BlockSpec((1, embed_dim), lambda b: (0, 0)),             # c_proj bias
        ],
        out_specs=pl.BlockSpec((1, S, embed_dim), lambda b: (b, 0, 0)),
        compiler_params=pltpu.CompilerParams(
            dimension_semantics=("parallel",)),
    )(hidden, c_attn_w, c_attn_b.reshape(1, three_split),
      c_proj_w, c_proj_b.reshape(1, embed_dim))


# -------------------------------- reference (jnp) ------------------------------
def _reference(x, c_proj_w, c_proj_b, *, num_heads, head_dim):
    B, S, _ = x.shape
    q, k, v = jnp.split(x, 3, axis=2)
    sh = lambda t: t.reshape(B, S, num_heads, head_dim).transpose(0, 2, 1, 3)
    q, k, v = sh(q), sh(k), sh(v)
    w = jnp.einsum("bhqd,bhkd->bhqk", q, k) / jnp.sqrt(jnp.float32(head_dim))
    mask = jnp.tril(jnp.ones((S, S), dtype=bool))
    w = jnp.where(mask, w, jnp.float32(-10000.0))
    w = jax.nn.softmax(w, axis=-1)
    o = jnp.einsum("bhqk,bhkd->bhqd", w, v)
    o = o.transpose(0, 2, 1, 3).reshape(B, S, num_heads * head_dim)
    return o @ c_proj_w + c_proj_b


if __name__ == "__main__":
    # config: hidden_size=1024, num_attention_heads=32, TP=16
    hidden_size = 1024
    num_attention_heads = 32
    num_heads = num_attention_heads // TP          # 2
    split_size = hidden_size // TP                 # 64
    head_dim = split_size // num_heads             # 32
    B, S = 2, 128

    key = jax.random.PRNGKey(0)
    kh, kwa, kba, kwp, kbp = jax.random.split(key, 5)
    hidden = jax.random.normal(kh, (B, S, hidden_size), dtype=jnp.float32)
    # Conv1D weights ~ N(0, 0.02); small nonzero biases to exercise the bias paths
    c_attn_w = 0.02 * jax.random.normal(kwa, (hidden_size, 3 * split_size), dtype=jnp.float32)
    c_attn_b = 0.02 * jax.random.normal(kba, (3 * split_size,), dtype=jnp.float32)
    c_proj_w = 0.02 * jax.random.normal(kwp, (split_size, hidden_size), dtype=jnp.float32)
    c_proj_b = 0.02 * jax.random.normal(kbp, (hidden_size,), dtype=jnp.float32)

    # pre-projected fused-QKV activations (what GPT2Attention.forward receives)
    x = hidden @ c_attn_w + c_attn_b
    ref = _reference(x, c_proj_w, c_proj_b, num_heads=num_heads, head_dim=head_dim)

    out1 = jax.block_until_ready(
        gpt2_attention_forward(x, c_proj_w, c_proj_b,
                               num_heads=num_heads, head_dim=head_dim))
    out2 = jax.block_until_ready(
        gpt2_attention_forward_fused_qkv(hidden, c_attn_w, c_attn_b, c_proj_w, c_proj_b,
                                         num_heads=num_heads, head_dim=head_dim))

    assert out1.shape == (B, S, hidden_size)
    assert out2.shape == (B, S, hidden_size)
    # tolerance relaxed 1e-4 -> 1e-3: softmax now uses the EUP approx reciprocal
    assert jnp.allclose(out1, ref, atol=1e-3, rtol=1e-3), "module-faithful kernel mismatch"
    assert jnp.allclose(out2, ref, atol=1e-3, rtol=1e-3), "c_attn-fused kernel mismatch"

    print("KERNEL_OK")
</pallas_src>

<mosaic_0001>
module attributes {stable_mosaic.version = 11 : i64} {
  func.func @_attn_proj_kernel(%arg0: i32, %arg1: memref<1x128x192xf32, #tpu.memory_space<vmem>>, %arg2: memref<64x1024xf32, #tpu.memory_space<vmem>>, %arg3: memref<1x1024xf32, #tpu.memory_space<vmem>>, %arg4: memref<1x128x1024xf32, #tpu.memory_space<vmem>>) attributes {dimension_semantics = [#tpu.dimension_semantics<parallel>], iteration_bounds = array<i64: 2>, scalar_prefetch = 0 : i64, scratch_operands = 0 : i64, tpu.core_type = #tpu.core_type<tc>, window_params = [{transform_indices = @transform_0, window_bounds = array<i64: 1, 128, 192>}, {pipeline_mode = #tpu.pipeline_mode<synchronous>, transform_indices = @transform_1, window_bounds = array<i64: 64, 1024>}, {pipeline_mode = #tpu.pipeline_mode<synchronous>, transform_indices = @transform_2, window_bounds = array<i64: 1, 1024>}, {transform_indices = @transform_3, window_bounds = array<i64: 1, 128, 1024>}]} {
    %c0 = arith.constant 0 : index
    %c0_0 = arith.constant 0 : index
    %c0_1 = arith.constant 0 : index
    %0 = vector.load %arg1[%c0, %c0_0, %c0_1] : memref<1x128x192xf32, #tpu.memory_space<vmem>>, vector<1x128x192xf32>
    %1 = vector.shape_cast %0 : vector<1x128x192xf32> to vector<128x192xf32>
    %c0_2 = arith.constant 0 : index
    %c0_3 = arith.constant 0 : index
    %2 = vector.load %arg2[%c0_2, %c0_3] : memref<64x1024xf32, #tpu.memory_space<vmem>>, vector<64x1024xf32>
    %c0_4 = arith.constant 0 : index
    %c0_5 = arith.constant 0 : index
    %3 = vector.load %arg3[%c0_4, %c0_5] : memref<1x1024xf32, #tpu.memory_space<vmem>>, vector<1x1024xf32>
    %4 = tpu.iota {dimensions = array<i32: 0>} : vector<128x128xi32>
    %5 = tpu.iota {dimensions = array<i32: 1>} : vector<128x128xi32>
    %6 = arith.cmpi sle, %5, %4 : vector<128x128xi32>
    %7 = vector.extract_strided_slice %1 {offsets = [0, 0], sizes = [128, 32], strides = [1, 1]} : vector<128x192xf32> to vector<128x32xf32>
    %cst = arith.constant 0.176776692 : f32
    %8 = vector.broadcast %cst : f32 to vector<128x32xf32>
    %9 = arith.mulf %7, %8 : vector<128x32xf32>
    %10 = vector.extract_strided_slice %1 {offsets = [0, 64], sizes = [128, 32], strides = [1, 1]} : vector<128x192xf32> to vector<128x32xf32>
    %11 = vector.extract_strided_slice %1 {offsets = [0, 128], sizes = [128, 32], strides = [1, 1]} : vector<128x192xf32> to vector<128x32xf32>
    %cst_6 = arith.constant dense<0.000000e+00> : vector<128x128xf32>
    %12 = tpu.matmul %9, %10, %cst_6 {dimension_numbers = #tpu.dot_dimension_numbers<[1], [1], [0], [0], [0, 0, 1, 0], [], []>} : vector<128x32xf32>, vector<128x32xf32>, vector<128x128xf32> -> vector<128x128xf32>
    %cst_7 = arith.constant -1.000000e+04 : f32
    %13 = vector.broadcast %cst_7 : f32 to vector<128x128xf32>
    %14 = arith.select %6, %12, %13 : vector<128x128xi1>, vector<128x128xf32>
    %cst_8 = arith.constant dense<0xFF800000> : vector<128xf32>
    %15 = vector.multi_reduction <maximumf>, %14, %cst_8 [1] : vector<128x128xf32> to vector<128xf32>
    %16 = vector.shape_cast %15 : vector<128xf32> to vector<128x1xf32>
    %17 = vector.broadcast %16 : vector<128x1xf32> to vector<128x128xf32>
    %18 = arith.subf %14, %17 : vector<128x128xf32>
    %19 = math.exp %18 : vector<128x128xf32>
    %cst_9 = arith.constant dense<0.000000e+00> : vector<128xf32>
    %20 = vector.multi_reduction <add>, %19, %cst_9 [1] : vector<128x128xf32> to vector<128xf32>
    %21 = vector.shape_cast %20 : vector<128xf32> to vector<128x1xf32>
    %22 = tpu.reciprocal %21 {approx = true} : vector<128x1xf32> -> vector<128x1xf32>
    %23 = vector.broadcast %22 : vector<128x1xf32> to vector<128x128xf32>
    %24 = arith.mulf %19, %23 : vector<128x128xf32>
    %cst_10 = arith.constant dense<0.000000e+00> : vector<128x32xf32>
    %25 = tpu.matmul %24, %11, %cst_10 {dimension_numbers = #tpu.dot_dimension_numbers<[1], [0], [0], [1], [0, 0, 1, 1], [], []>} : vector<128x128xf32>, vector<128x32xf32>, vector<128x32xf32> -> vector<128x32xf32>
    %26 = vector.extract_strided_slice %2 {offsets = [0, 0], sizes = [32, 1024], strides = [1, 1]} : vector<64x1024xf32> to vector<32x1024xf32>
    %cst_11 = arith.constant dense<0.000000e+00> : vector<128x1024xf32>
    %27 = tpu.matmul %25, %26, %cst_11 {dimension_numbers = #tpu.dot_dimension_numbers<[1], [0], [0], [1], [0, 0, 1, 1], [], []>} : vector<128x32xf32>, vector<32x1024xf32>, vector<128x1024xf32> -> vector<128x1024xf32>
    %28 = vector.extract_strided_slice %1 {offsets = [0, 32], sizes = [128, 32], strides = [1, 1]} : vector<128x192xf32> to vector<128x32xf32>
    %cst_12 = arith.constant 0.176776692 : f32
    %29 = vector.broadcast %cst_12 : f32 to vector<128x32xf32>
    %30 = arith.mulf %28, %29 : vector<128x32xf32>
    %31 = vector.extract_strided_slice %1 {offsets = [0, 96], sizes = [128, 32], strides = [1, 1]} : vector<128x192xf32> to vector<128x32xf32>
    %32 = vector.extract_strided_slice %1 {offsets = [0, 160], sizes = [128, 32], strides = [1, 1]} : vector<128x192xf32> to vector<128x32xf32>
    %cst_13 = arith.constant dense<0.000000e+00> : vector<128x128xf32>
    %33 = tpu.matmul %30, %31, %cst_13 {dimension_numbers = #tpu.dot_dimension_numbers<[1], [1], [0], [0], [0, 0, 1, 0], [], []>} : vector<128x32xf32>, vector<128x32xf32>, vector<128x128xf32> -> vector<128x128xf32>
    %cst_14 = arith.constant -1.000000e+04 : f32
    %34 = vector.broadcast %cst_14 : f32 to vector<128x128xf32>
    %35 = arith.select %6, %33, %34 : vector<128x128xi1>, vector<128x128xf32>
    %cst_15 = arith.constant dense<0xFF800000> : vector<128xf32>
    %36 = vector.multi_reduction <maximumf>, %35, %cst_15 [1] : vector<128x128xf32> to vector<128xf32>
    %37 = vector.shape_cast %36 : vector<128xf32> to vector<128x1xf32>
    %38 = vector.broadcast %37 : vector<128x1xf32> to vector<128x128xf32>
    %39 = arith.subf %35, %38 : vector<128x128xf32>
    %40 = math.exp %39 : vector<128x128xf32>
    %cst_16 = arith.constant dense<0.000000e+00> : vector<128xf32>
    %41 = vector.multi_reduction <add>, %40, %cst_16 [1] : vector<128x128xf32> to vector<128xf32>
    %42 = vector.shape_cast %41 : vector<128xf32> to vector<128x1xf32>
    %43 = tpu.reciprocal %42 {approx = true} : vector<128x1xf32> -> vector<128x1xf32>
    %44 = vector.broadcast %43 : vector<128x1xf32> to vector<128x128xf32>
    %45 = arith.mulf %40, %44 : vector<128x128xf32>
    %cst_17 = arith.constant dense<0.000000e+00> : vector<128x32xf32>
    %46 = tpu.matmul %45, %32, %cst_17 {dimension_numbers = #tpu.dot_dimension_numbers<[1], [0], [0], [1], [0, 0, 1, 1], [], []>} : vector<128x128xf32>, vector<128x32xf32>, vector<128x32xf32> -> vector<128x32xf32>
    %47 = vector.extract_strided_slice %2 {offsets = [32, 0], sizes = [32, 1024], strides = [1, 1]} : vector<64x1024xf32> to vector<32x1024xf32>
    %cst_18 = arith.constant dense<0.000000e+00> : vector<128x1024xf32>
    %48 = tpu.matmul %46, %47, %cst_18 {dimension_numbers = #tpu.dot_dimension_numbers<[1], [0], [0], [1], [0, 0, 1, 1], [], []>} : vector<128x32xf32>, vector<32x1024xf32>, vector<128x1024xf32> -> vector<128x1024xf32>
    %49 = arith.addf %27, %48 : vector<128x1024xf32>
    %50 = vector.broadcast %3 : vector<1x1024xf32> to vector<128x1024xf32>
    %51 = arith.addf %49, %50 : vector<128x1024xf32>
    %c0_19 = arith.constant 0 : index
    %c0_20 = arith.constant 0 : index
    %c0_21 = arith.constant 0 : index
    %52 = vector.load %arg4[%c0_19, %c0_20, %c0_21] : memref<1x128x1024xf32, #tpu.memory_space<vmem>>, vector<1x128x1024xf32>
    %53 = vector.shape_cast %52 : vector<1x128x1024xf32> to vector<128x1024xf32>
    %54 = vector.shape_cast %51 : vector<128x1024xf32> to vector<1x128x1024xf32>
    tpu.vector_store %arg4[%c0_19, %c0_20, %c0_21], %54 {strides = array<i32>} : memref<1x128x1024xf32, #tpu.memory_space<vmem>>, vector<1x128x1024xf32>,
    return
  }
  func.func @transform_0(%arg0: i32) -> (i32, i32, i32) {
    %c0_i32 = arith.constant 0 : i32
    %c0_i32_0 = arith.constant 0 : i32
    %c0_i32_1 = arith.constant 0 : i32
    return %arg0, %c0_i32, %c0_i32_0 : i32, i32, i32
  }
  func.func @transform_1(%arg0: i32) -> (i32, i32) {
    %c0_i32 = arith.constant 0 : i32
    %c0_i32_0 = arith.constant 0 : i32
    %c0_i32_1 = arith.constant 0 : i32
    return %c0_i32, %c0_i32_0 : i32, i32
  }
  func.func @transform_2(%arg0: i32) -> (i32, i32) {
    %c0_i32 = arith.constant 0 : i32
    %c0_i32_0 = arith.constant 0 : i32
    %c0_i32_1 = arith.constant 0 : i32
    return %c0_i32, %c0_i32_0 : i32, i32
  }
  func.func @transform_3(%arg0: i32) -> (i32, i32, i32) {
    %c0_i32 = arith.constant 0 : i32
    %c0_i32_0 = arith.constant 0 : i32
    %c0_i32_1 = arith.constant 0 : i32
    return %arg0, %c0_i32, %c0_i32_0 : i32, i32, i32
  }
}

</mosaic_0001>

<bundles_post_ra>
// kernel: tpu_custom_call.1
= control target key start
LH: loop header
LB: loop body
LE: loop exit
PB: predicated region body
PF: predicated region fallthrough
CT: control target
= control target key end

     0   :  { %8 = vsyncpa [#allocation3], 0  ;;  %s6443_s0 = inlined_call_operand.vmem [shape: f32[2,128,192], index: 0, kind: input, shape index: {}]   ;;  %s6444_s1 = inlined_call_operand.vmem [shape: f32[64,1024], index: 1, kind: input, shape index: {}]   ;;  %s6445_s2 = inlined_call_operand.vmem [shape: f32[1,1024], index: 2, kind: input, shape index: {}]   ;;  %s6446_s3 = inlined_call_operand.hbm [shape: f32[2,128,1024], index: 3, kind: output, shape index: {}]  }
   0x1   :  { %10 = vsyncpa [#allocation3 + $0x1], 0  ;;  %s4591_s12 = smov 0   ;;  %s4593_s13 = smov 0  }
   0x2   :  { %s4595_s14 = smov 0   ;;  %s4597_s15 = smov 0  }
   0x3 LB: > { %s4612_s16 = sadd.s32 4294967295, %s4563_s15   ;;  %s3295_s17 = sadd.s32 4294967294, %s4563_s15   ;;  %s4563_s15 = sphi %s4597_s15, %s6510_s15   ;;  %s4559_s14 = sphi %s4595_s14, %s6509_s14   ;;  %s4555_s13 = sphi %s4593_s13, %s6508_s13   ;;  %s4551_s12 = sphi %s4591_s12, %s6507_s12  }
   0x4   : > { %s4616_s18 = sadd.s32 1, %s4563_s15   ;;  %s91_s19 = sadd.s32 1, %s4559_s14 }
   0x5   : > { %s88_s20 = ssub.s32 %s4563_s15, %s4616_s18  ;;  %p101_p0 = scmp.ne.s32.totalorder %s4559_s14, %s4555_s13 }
   0x6   : > { %p89_p1 = scmp.eq.s32.totalorder %s88_s20, 0  ;;  %p102_p2 = scmp.eq.s32.totalorder %s4612_s16, 1 }
   0x7   : > { %p107_p3 = scmp.ne.s32.totalorder %s4555_s13, %s4551_s12  ;;  %p108_p4 = scmp.eq.s32.totalorder %s3295_s17, 1 }
   0x8   : > { %s4627_s21 = scalar_select %p89_p1, %s4559_s14, %s91_s19  }
   0x9   : > { %p4629_p5 = por %p102_p2, %p101_p0  ;;  %p4633_p6 = por %p108_p4, %p107_p3 }
   0xa   : > { %p3298_p7 = scmp.ge.s32.totalorder %s4563_s15, 1  ;;  %p140_p8 = scmp.lt.s32.totalorder %s4563_s15, 3 }
   0xc   : > { %p141_p9 = pnand %p3298_p7, %p140_p8 }
   0xe   : > { %144 = sbr.rel (%p141_p9) target bundleno = 2129 (0x851), region = 32 }
  0x15   : > { %p164_p10 = scmp.lt.s32.totalorder %s4612_s16, 1  ;;  %s4565_s29 = smov 64   ;;  %vm365_vm0 = vcmask 261120  }
  0x16   : > { %s4566_s30 = smov 32   ;;  %vm4743_vm1 = vmpackc.low %vm365_vm0, %vm365_vm0  ;;  %s4567_s4 = smov 96  }
  0x17   : > { %s165_s24 = scalar_select %p164_p10, %s4612_s16, 1 }
  0x18   : > { %s161_s20 = sand.u32 1, %s4555_s13   ;;  %s4569_s8 = smov [#allocation2]  }
  0x19   : > { %s3499_s25 = sshll.u32 %s165_s24, 8  ;;  %s3299_s26 = sshll.u32 %s161_s20, 10 }
  0x1a   : > { %s4644_s28 = scalar_lea.vmem %s6443_s0, %s3499_s25  ;;  %s6120_s27 = scalar_lea.vmem [#allocation2], %s3299_s26 }
  0x1b   : > { %v169_v0 = vld [vmem:[%s4644_s28] sm:$0xff]  ;;  %v4648_v1 = vld [vmem:[%s4644_s28 + $0x10] sm:$0xff]  ;;  %s6401_s6 = scalar_lea.sflag [#allocation3], %s161_s20  ;;  %s4505_s9 = sshll.u32 %s4569_s8, 4  ;;  %s4506_s9 = int_to_ptr.vmem [resolvable:$false] %s4505_s9 }
  0x1c   : > { %v4651_v2 = vld [vmem:[%s4644_s28 + $0x20] sm:$0xff]  ;;  %v4249_v3 = vpack.i.bf16 %v4648_v1, %v169_v0  ;;  %v4655_v4 = vld [vmem:[%s4644_s28 + $0x30] sm:$0xff]  ;;  %v4736_v24 = vmul.f32 0.17677669, %v169_v0  ;;  %v4780_v58 = vmul.f32 0.17677669, %v4648_v1 }
  0x1d   : > { %v4658_v5 = vld [vmem:[%s4644_s28 + $0x40] sm:$0xff]  ;;  %v4661_v6 = vld [vmem:[%s4644_s28 + $0x50] sm:$0xff]  ;;  %v4676_v10 = vpack.i.bf16 %v4655_v4, %v4651_v2  ;;  %v4783_v59 = vmul.f32 0.17677669, %v4651_v2  ;;  %v4788_v60 = vmul.f32 0.17677669, %v4655_v4 }
  0x1e   : > { %v4665_v7 = vpack.i.bf16 %v4661_v6, %v4658_v5  ;;  %v4668_v8 = vld [vmem:[%s4644_s28 + $0x60] sm:$0xff]  ;;  %v4671_v9 = vld [vmem:[%s4644_s28 + $0x70] sm:$0xff]  ;;  %4250 = vrot.lane.b32.xlu0 %v4249_v3, %s4565_s29  ;;  %3661 = vmatprep.mubr.msk.f32.mxu0 %vm365_vm0, %v4736_v24  ;;  %v4791_v61 = vmul.f32 0.17677669, %v4658_v5  ;;  %v4796_v62 = vmul.f32 0.17677669, %v4661_v6 }
  0x1f   : > { %v4682_v11 = vpack.i.bf16 %v4671_v9, %v4668_v8  ;;  %v4685_v12 = vld [vmem:[%s4644_s28 + $0x80] sm:$0xff]  ;;  %v4688_v13 = vld [vmem:[%s4644_s28 + $0x90] sm:$0xff]  ;;  %v4803_v63 = vmul.f32 0.17677669, %v4668_v8  ;;  %v4808_v0 = vmul.f32 0.17677669, %v4671_v9 }
  0x20   : > { %4260 = vrot.lane.b32.xlu1 %v4665_v7, %s4565_s29  ;;  %v4691_v14 = vld [vmem:[%s4644_s28 + $0xa0] sm:$0xff]  ;;  %v4694_v15 = vld [vmem:[%s4644_s28 + $0xb0] sm:$0xff]  ;;  %v4700_v16 = vpack.i.bf16 %v4688_v13, %v4685_v12  ;;  %v4813_v1 = vmul.f32 0.17677669, %v4685_v12  ;;  %v4818_v2 = vmul.f32 0.17677669, %v4688_v13 }
  0x21   : > { %v4706_v17 = vpack.i.bf16 %v4694_v15, %v4691_v14  ;;  %v4709_v18 = vld [vmem:[%s4644_s28 + $0xc0] sm:$0xff]  ;;  %v4712_v19 = vld [vmem:[%s4644_s28 + $0xd0] sm:$0xff]  ;;  %v4828_v4 = vmul.f32 0.17677669, %v4694_v15  ;;  %v4855_v12 = vld [vmem:[%s4644_s28 + $0x8] sm:$0xff]  ;;  %s4507_s10 = scalar_lea.vmem %s4506_s9, 32768 }
  0x22   : > { %4255 = vrot.lane.b32.xlu0 %v4676_v10, %s4565_s29  ;;  %v4715_v20 = vld [vmem:[%s4644_s28 + $0xe0] sm:$0xff]  ;;  %v4718_v21 = vld [vmem:[%s4644_s28 + $0xf0] sm:$0xff]  ;;  %v4724_v22 = vpack.i.bf16 %v4712_v19, %v4709_v18  ;;  %v4833_v5 = vmul.f32 0.17677669, %v4709_v18  ;;  %v4838_v6 = vmul.f32 0.17677669, %v4712_v19 }
  0x23   : > { %v4730_v23 = vpack.i.bf16 %v4718_v21, %v4715_v20  ;;  %v4843_v8 = vmul.f32 0.17677669, %v4715_v20  ;;  %v4848_v9 = vmul.f32 0.17677669, %v4718_v21  ;;  %v4858_v13 = vld [vmem:[%s4644_s28 + $0x18] sm:$0xff]  ;;  %v4865_v18 = vld [vmem:[%s4644_s28 + $0x28] sm:$0xff] }
  0x24   : > { %4265 = vrot.lane.b32.xlu1 %v4682_v11, %s4565_s29  ;;  %v4868_v19 = vld [vmem:[%s4644_s28 + $0x38] sm:$0xff]  ;;  %v4873_v21 = vld [vmem:[%s4644_s28 + $0x48] sm:$0xff] }
  0x25   : > { %v3905_v20 = vpack.c.bf16 %v4868_v19, %v4865_v18 }
  0x26   : > { %4270 = vrot.lane.b32.xlu0 %v4700_v16, %s4565_s29 }
  0x28   : > { %4275 = vrot.lane.b32.xlu1 %v4706_v17, %s4565_s29 }
  0x2a   : > { %4280 = vrot.lane.b32.xlu0 %v4724_v22, %s4565_s29 }
  0x2c   : > { %4285 = vrot.lane.b32.xlu1 %v4730_v23, %s4565_s29 }
  0x30   : > { %4290 = vrot.lane.b32.xlu1 %v4249_v3, %s4566_s30  ;;  %v4823_v3 = vmul.f32 0.17677669, %v4691_v14  ;;  %v3901_v14 = vpack.c.bf16 %v4858_v13, %v4855_v12 }
  0x32   : > { %3902 = vmatprep.subr.bf16.mxu1 %v3901_v14 }
  0x33   : > { %3904 = vmatpush3.bf16.msra.mxu1 %v3901_v14 }
  0x34   : > { %3906 = vmatprep.subr.bf16.mxu1 %v3905_v20 }
  0x37   : > { %3908 = vmatpush3.bf16.msra.mxu1 %v3905_v20 }
  0x90   : > { %v4251_v25 = vpop.permute.xlu0 %4250 }
  0x91   : > { %v4253_v26 = vunpack.i.h.bf16 %v4251_v25  ;;  %v4252_v27 = vunpack.i.l.bf16 %v4251_v25  ;;  %v4876_v25 = vld [vmem:[%s4644_s28 + $0x58] sm:$0xff] }
  0x92   : > { %v4261_v31 = vpop.permute.xlu1 %4260 }
  0x93   : > { %v3853_v29 = vpack.c.bf16 %v4253_v26, %v4252_v27  ;;  %v4263_v35 = vunpack.i.h.bf16 %v4261_v31  ;;  %v4262_v36 = vunpack.i.l.bf16 %v4261_v31  ;;  %v3909_v26 = vpack.c.bf16 %v4876_v25, %v4873_v21  ;;  %v4881_v27 = vld [vmem:[%s4644_s28 + $0x68] sm:$0xff] }
  0x94   : > { %v4256_v30 = vpop.permute.xlu0 %4255  ;;  %v4889_v31 = vld [vmem:[%s4644_s28 + $0x88] sm:$0xff] }
  0x95   : > { %3855 = vmatprep.subr.msk.bf16.mxu0 %vm4743_vm1, %v3853_v29  ;;  %v4258_v32 = vunpack.i.h.bf16 %v4256_v30  ;;  %v4257_v33 = vunpack.i.l.bf16 %v4256_v30  ;;  %v3865_v37 = vpack.c.bf16 %v4263_v35, %v4262_v36  ;;  %3910 = vmatprep.subr.bf16.mxu1 %v3909_v26  ;;  %6470 = vst [vmem:[#allocation5_spill] sm:$0xff] %v4889_v31  ;;  %v4900_v35 = vld [vmem:[%s4644_s28 + $0xb8] sm:$0xff] }
  0x96   : > { %3858 = vmatpush3.bf16.xpose.msk.msra.mxu0 %vm4743_vm1, %v3853_v29  ;;  %v4266_v38 = vpop.permute.xlu1 %4265  ;;  %3912 = vmatpush3.bf16.msra.mxu1 %v3909_v26  ;;  %v4884_v29 = vld [vmem:[%s4644_s28 + $0x78] sm:$0xff]  ;;  %6473 = vst [vmem:[#allocation8_spill] sm:$0xff] %v4900_v35 }
  0x97   : > { %v3859_v34 = vpack.c.bf16 %v4258_v32, %v4257_v33  ;;  %v4268_v39 = vunpack.i.h.bf16 %v4266_v38  ;;  %v4267_v40 = vunpack.i.l.bf16 %v4266_v38  ;;  %v3913_v30 = vpack.c.bf16 %v4884_v29, %v4881_v27  ;;  %v4892_v32 = vld [vmem:[%s4644_s28 + $0x98] sm:$0xff] }
  0x98   : > { %v4271_v42 = vpop.permute.xlu0 %4270  ;;  %6471 = vst [vmem:[#allocation6_spill] sm:$0xff] %v4892_v32  ;;  %v3917_v33 = vpack.c.bf16 %v4892_v32, %v4889_v31  ;;  %v196_v38 = vld [vmem:[%s4644_s28 + $0xd8] sm:$0xff] }
  0x99   : > { %3861 = vmatprep.subr.msk.bf16.mxu0 %vm4743_vm1, %v3859_v34  ;;  %v3871_v41 = vpack.c.bf16 %v4268_v39, %v4267_v40  ;;  %v4273_v43 = vunpack.i.h.bf16 %v4271_v42  ;;  %v4272_v44 = vunpack.i.l.bf16 %v4271_v42  ;;  %3914 = vmatprep.subr.bf16.mxu1 %v3913_v30  ;;  %v200_v42 = vld [vmem:[%s4644_s28 + $0xf8] sm:$0xff] }
  0x9a   : > { %v4276_v46 = vpop.permute.xlu1 %4275  ;;  %3916 = vmatpush3.bf16.msra.mxu1 %v3913_v30 }
  0x9b   : > { %v3877_v45 = vpack.c.bf16 %v4273_v43, %v4272_v44  ;;  %v4278_v47 = vunpack.i.h.bf16 %v4276_v46  ;;  %v4277_v48 = vunpack.i.l.bf16 %v4276_v46  ;;  %3918 = vmatprep.subr.bf16.mxu1 %v3917_v33 }
  0x9c   : > { %v4281_v50 = vpop.permute.xlu0 %4280 }
  0x9d   : > { %v3883_v49 = vpack.c.bf16 %v4278_v47, %v4277_v48  ;;  %v4283_v51 = vunpack.i.h.bf16 %v4281_v50  ;;  %v4282_v52 = vunpack.i.l.bf16 %v4281_v50  ;;  %v266_v47 = vlaneseq }
  0x9e   : > { %3864 = vmatpush3.bf16.xpose.msk.msra.mxu0 %vm4743_vm1, %v3859_v34  ;;  %v4286_v54 = vpop.permute.xlu1 %4285  ;;  %3920 = vmatpush3.bf16.msra.mxu1 %v3917_v33  ;;  %v4897_v34 = vld [vmem:[%s4644_s28 + $0xa8] sm:$0xff] }
  0x9f   : > { %3867 = vmatprep.subr.msk.bf16.mxu0 %vm4743_vm1, %v3865_v37  ;;  %v3889_v53 = vpack.c.bf16 %v4283_v51, %v4282_v52  ;;  %v4288_v55 = vunpack.i.h.bf16 %v4286_v54  ;;  %v4287_v56 = vunpack.i.l.bf16 %v4286_v54  ;;  %6472 = vst [vmem:[#allocation7_spill] sm:$0xff] %v4897_v34  ;;  %v3921_v36 = vpack.c.bf16 %v4900_v35, %v4897_v34 }
  0xa0   : > { %v4913_v48 = vshrl.u32 %v266_v47, 7  ;;  %v4918_v50 = vand.u32 127, %v266_v47 }
  0xa1   : > { %v3895_v57 = vpack.c.bf16 %v4288_v55, %v4287_v56  ;;  %3922 = vmatprep.subr.bf16.mxu1 %v3921_v36 }
  0xa2   : > { %3924 = vmatpush3.bf16.msra.mxu1 %v3921_v36  ;;  %v4291_v40 = vpop.permute.xlu1 %4290  ;;  %vm285_vm3 = vcmp.le.s32.totalorder %v4918_v50, %v4913_v48  ;;  %v4977_v47 = vadd.s32 64, %v4913_v48  ;;  %v5004_v15 = vadd.s32 80, %v4913_v48  ;;  %v5026_v35 = vadd.s32 96, %v4913_v48 }
  0xa3   : > { %v4293_v43 = vunpack.i.h.bf16 %v4291_v40  ;;  %v4292_v44 = vunpack.i.l.bf16 %v4291_v40  ;;  %v5031_v34 = vadd.s32 88, %v4913_v48  ;;  %v5048_v32 = vadd.s32 112, %v4913_v48 }
  0xa4   : > { %6478 = vst [vmem:[#allocation13_spill] sm:$0xff] %v4977_v47  ;;  %vm293_vm9 = vcmp.le.s32.totalorder %v4918_v50, %v4977_v47  ;;  %6480 = vst [vmem:[#allocation15_spill] sm:$0xff] %v5004_v15  ;;  %vm6451_vm11 = vcmp.le.s32.totalorder %v4918_v50, %v5004_v15  ;;  %vm6453_vm13 = vcmp.le.s32.totalorder %v4918_v50, %v5026_v35  ;;  %v5053_v31 = vadd.s32 104, %v4913_v48 }
  0xa5   : > { %v4908_v46 = vpack.c.bf16 %v4293_v43, %v4292_v44  ;;  %v4946_v43 = vadd.s32 32, %v4913_v48  ;;  %v4964_v44 = vadd.s32 40, %v4913_v48  ;;  %6482 = vst [vmem:[#allocation17_spill] sm:$0xff] %v5026_v35  ;;  %6483 = vst [vmem:[#allocation18_spill] sm:$0xff] %v5031_v34  ;;  %vm296_vm14 = vcmp.le.s32.totalorder %v4918_v50, %v5031_v34 }
  0xa6   : > { %3870 = vmatpush3.bf16.xpose.msk.msra.mxu0 %vm4743_vm1, %v3865_v37  ;;  %v194_v37 = vld [vmem:[%s4644_s28 + $0xc8] sm:$0xff]  ;;  %6484 = vst [vmem:[#allocation19_spill] sm:$0xff] %v5048_v32  ;;  %6485 = vst [vmem:[#allocation20_spill] sm:$0xff] %v5053_v31  ;;  %vm299_vm15 = vcmp.le.s32.totalorder %v4918_v50, %v5048_v32  ;;  %v5072_v15 = vadd.s32 120, %v4913_v48 }
  0xa7   : > { %3873 = vmatprep.subr.msk.bf16.mxu0 %vm4743_vm1, %v3871_v41  ;;  %v3925_v39 = vpack.c.bf16 %v196_v38, %v194_v37  ;;  %6474 = vst [vmem:[#allocation9_spill] sm:$0xff] %v4946_v43  ;;  %vm289_vm5 = vcmp.le.s32.totalorder %v4918_v50, %v4946_v43  ;;  %6477 = vst [vmem:[#allocation12_spill] sm:$0xff] %v4964_v44  ;;  %vm290_vm8 = vcmp.le.s32.totalorder %v4918_v50, %v4964_v44 }
  0xa8   : > { %6486 = vst [vmem:[#allocation21_spill] sm:$0xff] %v5072_v15 }
  0xa9   : > { %3926 = vmatprep.subr.bf16.mxu1 %v3925_v39 }
  0xaa   : > { %3928 = vmatpush3.bf16.msra.mxu1 %v3925_v39 }
  0xae   : > { %3876 = vmatpush3.bf16.xpose.msk.msra.mxu0 %vm4743_vm1, %v3871_v41  ;;  %v198_v41 = vld [vmem:[%s4644_s28 + $0xe8] sm:$0xff] }
  0xaf   : > { %3879 = vmatprep.subr.msk.bf16.mxu0 %vm4743_vm1, %v3877_v45 }
  0xb6   : > { %3882 = vmatpush3.bf16.xpose.msk.msra.mxu0 %vm4743_vm1, %v3877_v45  ;;  %v3929_v45 = vpack.c.bf16 %v200_v42, %v198_v41  ;;  %v4943_v42 = vadd.s32 24, %v4913_v48 }
  0xb7   : > { %3885 = vmatprep.subr.msk.bf16.mxu0 %vm4743_vm1, %v3883_v49 }
  0xb8   : > { %3930 = vmatprep.subr.bf16.mxu1 %v3929_v45  ;;  %vm288_vm4 = vcmp.le.s32.totalorder %v4918_v50, %v4943_v42 }
  0xb9   : > { %3932 = vmatpush3.bf16.msra.mxu1 %v3929_v45 }
  0xba   : > { %3935 = vmatprep.subr.msk.bf16.mxu1 %vm4743_vm1, %v4908_v46 }
  0xbe   : > { %3888 = vmatpush3.bf16.xpose.msk.msra.mxu0 %vm4743_vm1, %v3883_v49  ;;  %v4916_v49 = vadd.s32 8, %v4913_v48 }
  0xbf   : > { %3891 = vmatprep.subr.msk.bf16.mxu0 %vm4743_vm1, %v3889_v53 }
  0xc0   : > { %vm286_vm2 = vcmp.le.s32.totalorder %v4918_v50, %v4916_v49 }
  0xc6   : > { %3894 = vmatpush3.bf16.xpose.msk.msra.mxu0 %vm4743_vm1, %v3889_v53 }
  0xc7   : > { %3897 = vmatprep.subr.msk.bf16.mxu0 %vm4743_vm1, %v3895_v57 }
  0xce   : > { %3900 = vmatpush3.bf16.xpose.msk.msra.mxu0 %vm4743_vm1, %v3895_v57 }
  0xd5   : > { %3662 = vmatmul.mubr.msk.f32.vlgmr.msra.gmra.mrb[0].mxu0 %vm365_vm0, %v4780_v58 }
  0xd6   : > { %3664 = vmatprep.mubr.msk.f32.mxu0 %vm365_vm0, %v4783_v59 }
  0xd9   : > { %3665 = vmatmul.mubr.msk.f32.gmra.mrb[2].mxu0 %vm365_vm0, %v4788_v60 }
  0xda   : > { %3667 = vmatprep.mubr.msk.f32.mxu0 %vm365_vm0, %v4791_v61 }
  0xdd   : > { %3668 = vmatmul.mubr.msk.f32.gmra.mrb[4].mxu0 %vm365_vm0, %v4796_v62 }
  0xde   : > { %3670 = vmatprep.mubr.msk.f32.mxu0 %vm365_vm0, %v4803_v63 }
  0xe1   : > { %3671 = vmatmul.mubr.msk.f32.gmra.mrb[6].mxu0 %vm365_vm0, %v4808_v0 }
  0xe2   : > { %3673 = vmatprep.mubr.msk.f32.mxu0 %vm365_vm0, %v4813_v1 }
  0xe5   : > { %3674 = vmatmul.mubr.msk.f32.gmra.mrb[8].mxu0 %vm365_vm0, %v4818_v2 }
  0xe6   : > { %3676 = vmatprep.mubr.msk.f32.mxu0 %vm365_vm0, %v4823_v3 }
  0xe9   : > { %3677 = vmatmul.mubr.msk.f32.gmra.mrb[10].mxu0 %vm365_vm0, %v4828_v4 }
  0xea   : > { %3679 = vmatprep.mubr.msk.f32.mxu0 %vm365_vm0, %v4833_v5 }
  0xed   : > { %3680 = vmatmul.mubr.msk.f32.gmra.mrb[12].mxu0 %vm365_vm0, %v4838_v6 }
  0xee   : > { %3682 = vmatprep.mubr.msk.f32.mxu0 %vm365_vm0, %v4843_v8 }
  0xf1   : > { %3683 = vmatmul.mubr.msk.f32.gmra.mrb[14].mxu0 %vm365_vm0, %v4848_v9 }
 0x1a8   : > { %v3663_v51 = vpop.f32.mrb[0].mxu0 }
 0x1a9   : > { %v512_v52 = vpop.f32.mrb[1].mxu0  ;;  %v4927_v53 = vsel %vm286_vm2, %v3663_v51, -10000.0  ;;  %v4982_v51 = vadd.s32 56, %v4913_v48 }
 0x1aa   : > { %609 = vmax.xlane.f32.xlu1 %v4927_v53  ;;  %v4933_v54 = vsel %vm285_vm3, %v512_v52, -10000.0 }
 0x1ab   : > { %607 = vmax.xlane.f32.xlu0 %v4933_v54  ;;  %6479 = vst [vmem:[#allocation14_spill] sm:$0xff] %v4982_v51  ;;  %vm292_vm10 = vcmp.le.s32.totalorder %v4918_v50, %v4982_v51 }
 0x1ac   : > { %v3666_v55 = vpop.f32.mrb[2].mxu0 }
 0x1ad   : > { %v522_v56 = vpop.f32.mrb[3].mxu0 }
 0x1b0   : > { %v3669_v57 = vpop.f32.mrb[4].mxu0 }
 0x1b1   : > { %v532_v14 = vpop.f32.mrb[5].mxu0 }
 0x1b2   : > { %v4970_v45 = vsel %vm289_vm5, %v532_v14, -10000.0  ;;  %v4999_v14 = vsel %vm290_vm8, %v3669_v57, -10000.0 }
 0x1b4   : > { %v3672_v20 = vpop.f32.mrb[6].mxu0 }
 0x1b5   : > { %v542_v26 = vpop.f32.mrb[7].mxu0 }
 0x1b8   : > { %v3675_v30 = vpop.f32.mrb[8].mxu0 }
 0x1b9   : > { %v552_v33 = vpop.f32.mrb[9].mxu0 }
 0x1ba   : > { %v5016_v57 = vsel %vm293_vm9, %v552_v33, -10000.0 }
 0x1bb   : > { %4300 = vrot.lane.b32.xlu1 %v4665_v7, %s4566_s30  ;;  %v4951_v7 = vadd.s32 16, %v4913_v48 }
 0x1bc   : > { %v3678_v36 = vpop.f32.mrb[10].mxu0 }
 0x1bd   : > { %v562_v37 = vpop.f32.mrb[11].mxu0  ;;  %6475 = vst [vmem:[#allocation10_spill] sm:$0xff] %v4951_v7  ;;  %vm287_vm6 = vcmp.le.s32.totalorder %v4918_v50, %v4951_v7 }
 0x1be   : > { %v4988_v52 = vsel %vm287_vm6, %v522_v56, -10000.0  ;;  %v5009_v56 = vadd.s32 72, %v4913_v48 }
 0x1bf   : > { %4305 = vrot.lane.b32.xlu1 %v4682_v11, %s4566_s30  ;;  %v4956_v11 = vsel %vm288_vm4, %v3666_v55, -10000.0 }
 0x1c0   : > { %v3681_v38 = vpop.f32.mrb[12].mxu0  ;;  %6481 = vst [vmem:[#allocation16_spill] sm:$0xff] %v5009_v56  ;;  %vm294_vm12 = vcmp.le.s32.totalorder %v4918_v50, %v5009_v56 }
 0x1c1   : > { %4295 = vrot.lane.b32.xlu0 %v4676_v10, %s4566_s30  ;;  %v572_v39 = vpop.f32.mrb[13].mxu0  ;;  %v4961_v10 = vadd.s32 48, %v4913_v48  ;;  %v5043_v33 = vsel %vm294_vm12, %v3675_v30, -10000.0 }
 0x1c2   : > { %v5060_v30 = vsel %vm6453_vm13, %v572_v39, -10000.0  ;;  %vm300_vm13 = vcmp.le.s32.totalorder %v4918_v50, %v5072_v15 }
 0x1c3   : > { %6476 = vst [vmem:[#allocation11_spill] sm:$0xff] %v4961_v10  ;;  %vm291_vm7 = vcmp.le.s32.totalorder %v4918_v50, %v4961_v10 }
 0x1c4   : > { %v3684_v40 = vpop.f32.mrb[14].mxu0  ;;  %v4994_v55 = vsel %vm291_vm7, %v542_v26, -10000.0  ;;  %v5021_v26 = vsel %vm292_vm10, %v3672_v20, -10000.0  ;;  %v5038_v20 = vsel %vm6451_vm11, %v562_v37, -10000.0  ;;  %v5065_v37 = vsel %vm296_vm14, %v3678_v36, -10000.0 }
 0x1c5   : > { %v582_v41 = vpop.f32.mrb[15].mxu0  ;;  %vm298_vm11 = vcmp.le.s32.totalorder %v4918_v50, %v5053_v31  ;;  %v5093_v35 = vsel %vm300_vm13, %v3684_v40, -10000.0 }
 0x1c6   : > { %v5079_v39 = vsel %vm299_vm15, %v582_v41, -10000.0  ;;  %v5084_v36 = vsel %vm298_vm11, %v3681_v38, -10000.0 }
 0x1e0   : > { %613 = vmax.xlane.f32.xlu0 %v4956_v11 }
 0x1e3   : > { %615 = vmax.xlane.f32.xlu1 %v4970_v45 }
 0x1e4   : > { %611 = vmax.xlane.f32.xlu0 %v4988_v52 }
 0x1e7   : > { %619 = vmax.xlane.f32.xlu1 %v4994_v55 }
 0x1e8   : > { %617 = vmax.xlane.f32.xlu0 %v4999_v14 }
 0x1eb   : > { %623 = vmax.xlane.f32.xlu1 %v5016_v57 }
 0x1ec   : > { %621 = vmax.xlane.f32.xlu0 %v5021_v26 }
 0x1ef   : > { %627 = vmax.xlane.f32.xlu1 %v5038_v20 }
 0x1f0   : > { %625 = vmax.xlane.f32.xlu0 %v5043_v33 }
 0x1f3   : > { %631 = vmax.xlane.f32.xlu1 %v5060_v30 }
 0x1f4   : > { %629 = vmax.xlane.f32.xlu0 %v5065_v37 }
 0x1f7   : > { %635 = vmax.xlane.f32.xlu1 %v5079_v39 }
 0x1f8   : > { %633 = vmax.xlane.f32.xlu0 %v5084_v36 }
 0x1fc   : > { %637 = vmax.xlane.f32.xlu0 %v5093_v35 }
 0x208   : > { %4315 = vrot.lane.b32.xlu1 %v4706_v17, %s4566_s30 }
 0x20c   : > { %4320 = vrot.lane.b32.xlu1 %v4724_v22, %s4566_s30 }
 0x237   : > { %v610_v38 = vpop.xlane.xlu1 %609 }
 0x238   : > { %v640_v41 = vsub.f32 %v4927_v53, %v610_v38  ;;  %v608_v32 = vpop.xlane.xlu0 %607 }
 0x239   : > { %v639_v31 = vsub.f32 %v4933_v54, %v608_v32 }
 0x23a   : > { %v657_v34 = vmul.f32 1.442695, %v640_v41 }
 0x23b   : > { %v655_v56 = vmul.f32 1.442695, %v639_v31  ;;  %v5110_v17 = vpop.permute.xlu1 %4300 }
 0x23c   : > { %4369 = vpow2.f32 %v657_v34  ;;  %v5112_v22 = vpop.permute.xlu0 %4295 }
 0x23d   : > { %4371 = vpow2.f32 %v655_v56 }
 0x23f   : > { %v5114_v32 = vpop.permute.xlu1 %4305 }
 0x246   : > { %v5102_v40 = vpop.eup %4369 }
 0x247   : > { %v5104_v15 = vpop.eup %4371  ;;  %689 = vadd.xlane.f32.xlu0 %v5102_v40 }
 0x248   : > { %687 = vadd.xlane.f32.xlu1 %v5104_v15 }
 0x25d   : > { %4310 = vrot.lane.b32.xlu0 %v4700_v16, %s4566_s30 }
 0x26d   : > { %v614_v31 = vpop.xlane.xlu0 %613 }
 0x26e   : > { %v642_v34 = vsub.f32 %v4956_v11, %v614_v31 }
 0x270   : > { %v661_v53 = vmul.f32 1.442695, %v642_v34  ;;  %v616_v54 = vpop.xlane.xlu1 %615 }
 0x271   : > { %v643_v56 = vsub.f32 %v4970_v45, %v616_v54  ;;  %v612_v38 = vpop.xlane.xlu0 %611 }
 0x272   : > { %4373 = vpow2.f32 %v661_v53  ;;  %v641_v41 = vsub.f32 %v4988_v52, %v612_v38 }
 0x273   : > { %v663_v51 = vmul.f32 1.442695, %v643_v56 }
 0x274   : > { %v659_v47 = vmul.f32 1.442695, %v641_v41  ;;  %v620_v44 = vpop.xlane.xlu1 %619 }
 0x275   : > { %v618_v16 = vpop.xlane.xlu0 %617  ;;  %v645_v11 = vsub.f32 %v4994_v55, %v620_v44 }
 0x276   : > { %4375 = vpow2.f32 %v659_v47  ;;  %v644_v10 = vsub.f32 %v4999_v14, %v618_v16 }
 0x277   : > { %4377 = vpow2.f32 %v663_v51  ;;  %v667_v54 = vmul.f32 1.442695, %v645_v11 }
 0x278   : > { %v665_v43 = vmul.f32 1.442695, %v644_v10  ;;  %v624_v53 = vpop.xlane.xlu1 %623 }
 0x279   : > { %v622_v7 = vpop.xlane.xlu0 %621 }
 0x27a   : > { %4379 = vpow2.f32 %v665_v43  ;;  %v646_v31 = vsub.f32 %v5021_v26, %v622_v7  ;;  %v647_v43 = vsub.f32 %v5016_v57, %v624_v53 }
 0x27c   : > { %v5122_v45 = vpop.eup %4373  ;;  %v669_v34 = vmul.f32 1.442695, %v646_v31  ;;  %v628_v51 = vpop.xlane.xlu1 %627  ;;  %v671_v26 = vmul.f32 1.442695, %v647_v43 }
 0x27d   : > { %v626_v52 = vpop.xlane.xlu0 %625  ;;  %693 = vadd.xlane.f32.xlu0 %v5122_v45 }
 0x27e   : > { %4381 = vpow2.f32 %v669_v34  ;;  %v648_v47 = vsub.f32 %v5043_v33, %v626_v52  ;;  %v649_v33 = vsub.f32 %v5038_v20, %v628_v51 }
 0x27f   : > { %4383 = vpow2.f32 %v667_v54 }
 0x280   : > { %v5126_v14 = vpop.eup %4375  ;;  %v673_v7 = vmul.f32 1.442695, %v648_v47  ;;  %v632_v41 = vpop.xlane.xlu1 %631  ;;  %v675_v57 = vmul.f32 1.442695, %v649_v33 }
 0x281   : > { %v630_v10 = vpop.xlane.xlu0 %629  ;;  %691 = vadd.xlane.f32.xlu1 %v5126_v14  ;;  %v5130_v44 = vpop.eup %4377  ;;  %v651_v31 = vsub.f32 %v5060_v30, %v632_v41 }
 0x282   : > { %4385 = vpow2.f32 %v673_v7  ;;  %v650_v51 = vsub.f32 %v5065_v37, %v630_v10 }
 0x283   : > { %4387 = vpow2.f32 %v671_v26  ;;  %v679_v52 = vmul.f32 1.442695, %v651_v31 }
 0x284   : > { %v5132_v55 = vpop.eup %4379  ;;  %4389 = vpow2.f32 %v675_v57  ;;  %v636_v20 = vpop.xlane.xlu1 %635  ;;  %v677_v26 = vmul.f32 1.442695, %v650_v51 }
 0x285   : > { %697 = vadd.xlane.f32.xlu0 %v5132_v55  ;;  %695 = vadd.xlane.f32.xlu1 %v5130_v44  ;;  %v634_v56 = vpop.xlane.xlu0 %633  ;;  %v653_v54 = vsub.f32 %v5079_v39, %v636_v20 }
 0x286   : > { %v652_v16 = vsub.f32 %v5084_v36, %v634_v56 }
 0x287   : > { %v683_v36 = vmul.f32 1.442695, %v653_v54 }
 0x288   : > { %v5137_v38 = vpop.eup %4381  ;;  %v681_v34 = vmul.f32 1.442695, %v652_v16 }
 0x289   : > { %701 = vadd.xlane.f32.xlu0 %v5137_v38  ;;  %v5141_v11 = vpop.eup %4383 }
 0x28a   : > { %4391 = vpow2.f32 %v681_v34 }
 0x28b   : > { %4393 = vpow2.f32 %v679_v52 }
 0x28c   : > { %v5145_v53 = vpop.eup %4385  ;;  %4395 = vpow2.f32 %v683_v36 }
 0x28d   : > { %699 = vadd.xlane.f32.xlu0 %v5141_v11  ;;  %v5149_v47 = vpop.eup %4387  ;;  %4397 = vpow2.f32 %v677_v26 }
 0x28e   : > { %v5154_v30 = vpop.eup %4389 }
 0x291   : > { %705 = vadd.xlane.f32.xlu0 %v5145_v53 }
 0x294   : > { %v5157_v43 = vpop.eup %4391 }
 0x295   : > { %703 = vadd.xlane.f32.xlu0 %v5149_v47  ;;  %v5160_v39 = vpop.eup %4393 }
 0x296   : > { %4325 = vrot.lane.b32.xlu1 %v4730_v23, %s4566_s30  ;;  %v5163_v7 = vpop.eup %4395  ;;  %v638_v23 = vpop.xlane.xlu0 %637  ;;  %s3233_s30 = sshll.u32 %s6120_s27, 4  ;;  %s6393_s30 = int_to_ptr.vmem [resolvable:$true] %s3233_s30 }
 0x297   : > { %v654_v33 = vsub.f32 %v5093_v35, %v638_v23  ;;  %v5168_v41 = vpop.eup %4397  ;;  %v4316_v35 = vpop.permute.xlu1 %4315  ;;  %s4501_s7 = scalar_lea.vmem %s6393_s30, 16384  ;;  %p4508_p0 = scmp.lt.s32.totalorder %s6393_s30, %s4506_s9 }
 0x298   : > { %p4502_p11 = scmp.ne.s32.totalorder %s6393_s30, %s4501_s7  ;;  %p4509_p1 = scmp.lt.s32.totalorder %s4507_s10, %s4501_s7 }
 0x299   : > { %707 = vadd.xlane.f32.xlu0 %v5154_v30  ;;  %v685_v56 = vmul.f32 1.442695, %v654_v33 }
 0x29a   : > { %p4503_p12 = pnand %p4502_p11, %p4629_p5  ;;  %p4510_p2 = por %p4509_p1, %p4508_p0 }
 0x29b   : > { %4399 = vpow2.f32 %v685_v56 }
 0x29c   : > { %p4504_p13 = pneg %p4503_p12 }
 0x29d   : > { %713 = vadd.xlane.f32.xlu0 %v5157_v43 }
 0x29e   : > { %p4511_p3 = pnand %p4510_p2, %p4504_p13 }
 0x2a1   : > { %711 = vadd.xlane.f32.xlu0 %v5160_v39 }
 0x2a5   : > { %715 = vadd.xlane.f32.xlu0 %v5163_v7  ;;  %v5173_v57 = vpop.eup %4399 }
 0x2ba   : > { %709 = vadd.xlane.f32.xlu1 %v5168_v41 }
 0x2bb   : > { %896 = vrot.lane.b32.xlu0 %v4736_v24, %s4567_s4  ;;  %v4321_v24 = vpop.permute.xlu1 %4320 }
 0x2be   : > { %717 = vadd.xlane.f32.xlu1 %v5173_v57 }
 0x2bf   : > { %908 = vrot.lane.b32.xlu0 %v4803_v63, %s4567_s4 }
 0x2c3   : > { %912 = vrot.lane.b32.xlu0 %v4813_v1, %s4567_s4 }
 0x2c7   : > { %916 = vrot.lane.b32.xlu0 %v4823_v3, %s4567_s4 }
 0x2cb   : > { %920 = vrot.lane.b32.xlu0 %v4833_v5, %s4567_s4  ;;  %v4298_v5 = vunpack.i.h.bf16 %v5112_v22 }
 0x2cf   : > { %898 = vrot.lane.b32.xlu1 %v4780_v58, %s4567_s4  ;;  %924 = vrot.lane.b32.xlu0 %v4843_v8, %s4567_s4  ;;  %v4297_v8 = vunpack.i.l.bf16 %v5112_v22 }
 0x2d3   : > { %900 = vrot.lane.b32.xlu1 %v4783_v59, %s4567_s4 }
 0x2d4   : > { %v690_v63 = vpop.xlane.xlu0 %689 }
 0x2d5   : > { %4401 = vrcp.f32 %v690_v63  ;;  %v688_v1 = vpop.xlane.xlu1 %687 }
 0x2d6   : > { %4403 = vrcp.f32 %v688_v1 }
 0x2d7   : > { %902 = vrot.lane.b32.xlu1 %v4788_v60, %s4567_s4  ;;  %v3939_v60 = vpack.c.bf16 %v4298_v5, %v4297_v8 }
 0x2db   : > { %904 = vrot.lane.b32.xlu1 %v4791_v61, %s4567_s4  ;;  %v4303_v61 = vunpack.i.h.bf16 %v5110_v17 }
 0x2df   : > { %v4402_v3 = vpop.eup %4401  ;;  %906 = vrot.lane.b32.xlu1 %v4796_v62, %s4567_s4  ;;  %v4302_v62 = vunpack.i.l.bf16 %v5110_v17 }
 0x2e0   : > { %v4404_v58 = vpop.eup %4403  ;;  %v736_v37 = vmul.f32 %v4402_v3, %v5102_v40  ;;  %v4311_v40 = vpop.permute.xlu0 %4310 }
 0x2e1   : > { %v735_v59 = vmul.f32 %v4404_v58, %v5104_v15  ;;  %v4308_v15 = vunpack.i.h.bf16 %v5114_v32  ;;  %v4312_v17 = vunpack.i.l.bf16 %v4311_v40 }
 0x2e3   : > { %3717 = vmatprep.mubr.f32.mxu1 %v735_v59  ;;  %910 = vrot.lane.b32.xlu1 %v4808_v0, %s4567_s4  ;;  %v3945_v0 = vpack.c.bf16 %v4303_v61, %v4302_v62 }
 0x2e4   : > { %3718 = vmatmul.mubr.f32.vlgmr.msra.gmra.mrb[0].mxu1 %v736_v37 }
 0x2e5   : > { %3938 = vmatpush3.bf16.xpose.msk.msra.mxu1 %vm4743_vm1, %v4908_v46 }
 0x2e6   : > { %3941 = vmatprep.subr.msk.bf16.mxu1 %vm4743_vm1, %v3939_v60 }
 0x2e7   : > { %914 = vrot.lane.b32.xlu1 %v4818_v2, %s4567_s4  ;;  %v4307_v2 = vunpack.i.l.bf16 %v5114_v32  ;;  %v4317_v32 = vunpack.i.l.bf16 %v4316_v35 }
 0x2e9   : > { %v3951_v46 = vpack.c.bf16 %v4308_v15, %v4307_v2 }
 0x2eb   : > { %918 = vrot.lane.b32.xlu1 %v4828_v4, %s4567_s4  ;;  %v6487_v4 = vpack.i.bf16 %v4858_v13, %v4855_v12  ;;  %v4323_v12 = vunpack.i.h.bf16 %v4321_v24  ;;  %v4322_v13 = vunpack.i.l.bf16 %v4321_v24 }
 0x2ed   : > { %3944 = vmatpush3.bf16.xpose.msk.msra.mxu1 %vm4743_vm1, %v3939_v60  ;;  %v3969_v31 = vpack.c.bf16 %v4323_v12, %v4322_v13 }
 0x2ee   : > { %3947 = vmatprep.subr.msk.bf16.mxu1 %vm4743_vm1, %v3945_v0 }
 0x2ef   : > { %922 = vrot.lane.b32.xlu1 %v4838_v6, %s4567_s4  ;;  %v4313_v6 = vunpack.i.h.bf16 %v4311_v40 }
 0x2f1   : > { %v3957_v22 = vpack.c.bf16 %v4313_v6, %v4312_v17 }
 0x2f3   : > { %926 = vrot.lane.b32.xlu1 %v4848_v9, %s4567_s4  ;;  %v4318_v9 = vunpack.i.h.bf16 %v4316_v35 }
 0x2f5   : > { %3950 = vmatpush3.bf16.xpose.msk.msra.mxu1 %vm4743_vm1, %v3945_v0  ;;  %v3963_v10 = vpack.c.bf16 %v4318_v9, %v4317_v32 }
 0x2f6   : > { %3953 = vmatprep.subr.msk.bf16.mxu1 %vm4743_vm1, %v3951_v46 }
 0x2f7   : > { %4330 = vrot.lane.b32.xlu1 %v6487_v4, %s4567_s4 }
 0x2fd   : > { %3956 = vmatpush3.bf16.xpose.msk.msra.mxu1 %vm4743_vm1, %v3951_v46 }
 0x2fe   : > { %3959 = vmatprep.subr.msk.bf16.mxu1 %vm4743_vm1, %v3957_v22 }
 0x305   : > { %3962 = vmatpush3.bf16.xpose.msk.msra.mxu1 %vm4743_vm1, %v3957_v22 }
 0x306   : > { %3965 = vmatprep.subr.msk.bf16.mxu1 %vm4743_vm1, %v3963_v10 }
 0x30a   : > { %v694_v16 = vpop.xlane.xlu0 %693 }
 0x30b   : > { %4405 = vrcp.f32 %v694_v16 }
 0x30d   : > { %3968 = vmatpush3.bf16.xpose.msk.msra.mxu1 %vm4743_vm1, %v3963_v10 }
 0x30e   : > { %3971 = vmatprep.subr.msk.bf16.mxu1 %vm4743_vm1, %v3969_v31  ;;  %v692_v34 = vpop.xlane.xlu1 %691 }
 0x30f   : > { %4407 = vrcp.f32 %v692_v34 }
 0x312   : > { %v698_v20 = vpop.xlane.xlu0 %697  ;;  %v696_v52 = vpop.xlane.xlu1 %695 }
 0x313   : > { %4409 = vrcp.f32 %v698_v20 }
 0x314   : > { %4411 = vrcp.f32 %v696_v52 }
 0x315   : > { %3974 = vmatpush3.bf16.xpose.msk.msra.mxu1 %vm4743_vm1, %v3969_v31  ;;  %v4406_v26 = vpop.eup %4405 }
 0x316   : > { %v702_v54 = vpop.xlane.xlu0 %701  ;;  %v4326_v36 = vpop.permute.xlu1 %4325  ;;  %v738_v63 = vmul.f32 %v4406_v26, %v5122_v45  ;;  %v4334_v26 = vpack.i.bf16 %v4868_v19, %v4865_v18 }
 0x317   : > { %v4328_v51 = vunpack.i.h.bf16 %v4326_v36  ;;  %v4327_v23 = vunpack.i.l.bf16 %v4326_v36  ;;  %4413 = vrcp.f32 %v702_v54 }
 0x318   : > { %4335 = vrot.lane.b32.xlu0 %v4334_v26, %s4567_s4 }
 0x319   : > { %v4408_v33 = vpop.eup %4407  ;;  %v3975_v56 = vpack.c.bf16 %v4328_v51, %v4327_v23 }
 0x31a   : > { %v700_v35 = vpop.xlane.xlu0 %699  ;;  %v737_v24 = vmul.f32 %v4408_v33, %v5126_v14  ;;  %v4339_v33 = vpack.i.bf16 %v4876_v25, %v4873_v21 }
 0x31b   : > { %4415 = vrcp.f32 %v700_v35  ;;  %3977 = vmatprep.subr.msk.bf16.mxu1 %vm4743_vm1, %v3975_v56 }
 0x31c   : > { %3720 = vmatprep.mubr.f32.mxu1 %v737_v24  ;;  %4340 = vrot.lane.b32.xlu1 %v4339_v33, %s4567_s4 }
 0x31d   : > { %v4410_v1 = vpop.eup %4409  ;;  %3980 = vmatpush3.bf16.xpose.msk.msra.mxu1 %vm4743_vm1, %v3975_v56  ;;  %v4344_v56 = vpack.i.bf16 %v4884_v29, %v4881_v27 }
 0x31e   : > { %v4412_v3 = vpop.eup %4411  ;;  %3721 = vmatmul.mubr.f32.gmra.mrb[2].mxu1 %v738_v63  ;;  %v706_v58 = vpop.xlane.xlu0 %705  ;;  %v740_v5 = vmul.f32 %v4410_v1, %v5132_v55 }
 0x31f   : > { %v739_v8 = vmul.f32 %v4412_v3, %v5130_v44  ;;  %4417 = vrcp.f32 %v706_v58  ;;  %4345 = vrot.lane.b32.xlu0 %v4344_v56, %s4567_s4 }
 0x321   : > { %3723 = vmatprep.mubr.f32.mxu1 %v739_v8  ;;  %v4414_v59 = vpop.eup %4413 }
 0x322   : > { %3724 = vmatmul.mubr.f32.gmra.mrb[4].mxu1 %v740_v5  ;;  %v704_v14 = vpop.xlane.xlu0 %703  ;;  %v742_v28 = vmul.f32 %v4414_v59, %v5137_v38 }
 0x323   : > { %4419 = vrcp.f32 %v704_v14 }
 0x325   : > { %v4416_v37 = vpop.eup %4415 }
 0x326   : > { %v708_v60 = vpop.xlane.xlu0 %707  ;;  %v741_v45 = vmul.f32 %v4416_v37, %v5141_v11 }
 0x327   : > { %4421 = vrcp.f32 %v708_v60 }
 0x328   : > { %3726 = vmatprep.mubr.f32.mxu1 %v741_v45 }
 0x329   : > { %3727 = vmatmul.mubr.f32.gmra.mrb[6].mxu1 %v742_v28  ;;  %v4418_v61 = vpop.eup %4417 }
 0x32a   : > { %v744_v44 = vmul.f32 %v4418_v61, %v5145_v53  ;;  %v714_v2 = vpop.xlane.xlu0 %713 }
 0x32d   : > { %v4420_v62 = vpop.eup %4419 }
 0x32e   : > { %v743_v55 = vmul.f32 %v4420_v62, %v5149_v47  ;;  %v712_v46 = vpop.xlane.xlu0 %711 }
 0x32f   : > { %4423 = vrcp.f32 %v712_v46 }
 0x330   : > { %3729 = vmatprep.mubr.f32.mxu1 %v743_v55 }
 0x331   : > { %v4422_v0 = vpop.eup %4421  ;;  %3730 = vmatmul.mubr.f32.gmra.mrb[8].mxu1 %v744_v44 }
 0x332   : > { %v745_v15 = vmul.f32 %v4422_v0, %v5154_v30  ;;  %v716_v40 = vpop.xlane.xlu0 %715 }
 0x334   : > { %3732 = vmatprep.mubr.f32.mxu1 %v745_v15 }
 0x336   : > { %v897_v31 = vpop.permute.xlu0 %896 }
 0x339   : > { %v4424_v47 = vpop.eup %4423 }
 0x33a   : > { %v747_v30 = vmul.f32 %v4424_v47, %v5160_v39  ;;  %v909_v39 = vpop.permute.xlu0 %908 }
 0x347   : > { %v710_v11 = vpop.xlane.xlu1 %709 }
 0x348   : > { %4425 = vrcp.f32 %v710_v11 }
 0x349   : > { %4427 = vrcp.f32 %v714_v2 }
 0x34a   : > { %4429 = vrcp.f32 %v716_v40 }
 0x34b   : > { %v718_v38 = vpop.xlane.xlu1 %717 }
 0x34c   : > { %4431 = vrcp.f32 %v718_v38 }
 0x34f   : > { %v899_v4 = vpop.permute.xlu1 %898 }
 0x352   : > { %v4426_v6 = vpop.eup %4425 }
 0x353   : > { %v746_v53 = vmul.f32 %v4426_v6, %v5168_v41  ;;  %v901_v17 = vpop.permute.xlu1 %900  ;;  %v4428_v22 = vpop.eup %4427 }
 0x354   : > { %v4430_v9 = vpop.eup %4429  ;;  %v748_v32 = vmul.f32 %v4428_v22, %v5157_v43 }
 0x355   : > { %3733 = vmatmul.mubr.f32.gmra.mrb[10].mxu1 %v746_v53  ;;  %v749_v13 = vmul.f32 %v4430_v9, %v5163_v7  ;;  %v913_v7 = vpop.permute.xlu0 %912 }
 0x356   : > { %3735 = vmatprep.mubr.f32.mxu1 %v747_v30  ;;  %v4432_v12 = vpop.eup %4431 }
 0x357   : > { %v903_v10 = vpop.permute.xlu1 %902  ;;  %v750_v16 = vmul.f32 %v4432_v12, %v5173_v57 }
 0x359   : > { %3736 = vmatmul.mubr.f32.gmra.mrb[12].mxu1 %v748_v32  ;;  %v917_v20 = vpop.permute.xlu0 %916 }
 0x35a   : > { %3738 = vmatprep.mubr.f32.mxu1 %v749_v13 }
 0x35b   : > { %v905_v34 = vpop.permute.xlu1 %904 }
 0x35d   : > { %3739 = vmatmul.mubr.f32.gmra.mrb[14].mxu1 %v750_v16  ;;  %v921_v54 = vpop.permute.xlu0 %920 }
 0x35e   : > { %3773 = vmatprep.mubr.msk.f32.mxu1 %vm365_vm0, %v897_v31 }
 0x35f   : > { %v907_v41 = vpop.permute.xlu1 %906 }
 0x361   : > { %3774 = vmatmul.mubr.msk.f32.vlgmr.msra.gmra.mrb[16].mxu1 %vm365_vm0, %v899_v4  ;;  %v925_v51 = vpop.permute.xlu0 %924 }
 0x362   : > { %3776 = vmatprep.mubr.msk.f32.mxu1 %vm365_vm0, %v901_v17 }
 0x363   : > { %v911_v43 = vpop.permute.xlu1 %910 }
 0x365   : > { %3777 = vmatmul.mubr.msk.f32.gmra.mrb[18].mxu1 %vm365_vm0, %v903_v10 }
 0x366   : > { %3779 = vmatprep.mubr.msk.f32.mxu1 %vm365_vm0, %v905_v34 }
 0x367   : > { %v915_v57 = vpop.permute.xlu1 %914 }
 0x369   : > { %3780 = vmatmul.mubr.msk.f32.gmra.mrb[20].mxu1 %vm365_vm0, %v907_v41 }
 0x36a   : > { %3782 = vmatprep.mubr.msk.f32.mxu1 %vm365_vm0, %v909_v39 }
 0x36b   : > { %v919_v52 = vpop.permute.xlu1 %918 }
 0x36d   : > { %3783 = vmatmul.mubr.msk.f32.gmra.mrb[22].mxu1 %vm365_vm0, %v911_v43 }
 0x36e   : > { %3785 = vmatprep.mubr.msk.f32.mxu1 %vm365_vm0, %v913_v7 }
 0x36f   : > { %v923_v36 = vpop.permute.xlu1 %922 }
 0x371   : > { %3786 = vmatmul.mubr.msk.f32.gmra.mrb[24].mxu1 %vm365_vm0, %v915_v57 }
 0x372   : > { %3788 = vmatprep.mubr.msk.f32.mxu1 %vm365_vm0, %v917_v20 }
 0x373   : > { %v927_v23 = vpop.permute.xlu1 %926 }
 0x375   : > { %3789 = vmatmul.mubr.msk.f32.gmra.mrb[26].mxu1 %vm365_vm0, %v919_v52 }
 0x376   : > { %3791 = vmatprep.mubr.msk.f32.mxu1 %vm365_vm0, %v921_v54 }
 0x377   : > { %v4331_v25 = vpop.permute.xlu1 %4330 }
 0x378   : > { %v4333_v27 = vunpack.i.h.bf16 %v4331_v25  ;;  %v4332_v29 = vunpack.i.l.bf16 %v4331_v25 }
 0x379   : > { %3792 = vmatmul.mubr.msk.f32.gmra.mrb[28].mxu1 %vm365_vm0, %v923_v36 }
 0x37a   : > { %3794 = vmatprep.mubr.msk.f32.mxu1 %vm365_vm0, %v925_v51  ;;  %v3981_v58 = vpack.c.bf16 %v4333_v27, %v4332_v29 }
 0x37c   : > { %3982 = vmatprep.subr.bf16.mxu0 %v3981_v58 }
 0x37d   : > { %3795 = vmatmul.mubr.msk.f32.gmra.mrb[30].mxu1 %vm365_vm0, %v927_v23  ;;  %3984 = vmatpush3.bf16.msra.mxu0 %v3981_v58  ;;  %v6495_v58 = vld [vmem:[#allocation5_spill] sm:$0xff] }
 0x38a   : > { %v4336_v5 = vpop.permute.xlu0 %4335 }
 0x38b   : > { %v4338_v8 = vunpack.i.h.bf16 %v4336_v5  ;;  %v4337_v14 = vunpack.i.l.bf16 %v4336_v5  ;;  %v6496_v5 = vld [vmem:[#allocation6_spill] sm:$0xff] }
 0x38d   : > { %v3985_v59 = vpack.c.bf16 %v4338_v8, %v4337_v14  ;;  %v4349_v8 = vpack.i.bf16 %v6496_v5, %v6495_v58  ;;  %v6497_v14 = vld [vmem:[#allocation7_spill] sm:$0xff] }
 0x38e   : > { %v4341_v60 = vpop.permute.xlu1 %4340 }
 0x38f   : > { %v4343_v28 = vunpack.i.h.bf16 %v4341_v60  ;;  %v4342_v61 = vunpack.i.l.bf16 %v4341_v60  ;;  %3986 = vmatprep.subr.bf16.mxu0 %v3985_v59 }
 0x390   : > { %3988 = vmatpush3.bf16.msra.mxu0 %v3985_v59  ;;  %v6498_v59 = vld [vmem:[#allocation8_spill] sm:$0xff] }
 0x391   : > { %v3989_v62 = vpack.c.bf16 %v4343_v28, %v4342_v61  ;;  %v4346_v55 = vpop.permute.xlu0 %4345  ;;  %v4354_v60 = vpack.i.bf16 %v6498_v59, %v6497_v14  ;;  %v6499_v28 = vld [vmem:[#allocation15_spill] sm:$0xff] }
 0x392   : > { %v4348_v44 = vunpack.i.h.bf16 %v4346_v55  ;;  %v4347_v0 = vunpack.i.l.bf16 %v4346_v55  ;;  %vm6500_vm1 = vcmp.le.s32.totalorder %v4918_v50, %v6499_v28 }
 0x393   : > { %3990 = vmatprep.subr.bf16.mxu0 %v3989_v62 }
 0x394   : > { %3992 = vmatpush3.bf16.msra.mxu0 %v3989_v62  ;;  %v3993_v15 = vpack.c.bf16 %v4348_v44, %v4347_v0  ;;  %v6502_v44 = vld [vmem:[#allocation17_spill] sm:$0xff] }
 0x396   : > { %3994 = vmatprep.subr.bf16.mxu0 %v3993_v15 }
 0x398   : > { %3996 = vmatpush3.bf16.msra.mxu0 %v3993_v15 }
 0x3b7   : > { %v5288_v35 = vpop.f32.mrb[0].mxu1 }
 0x3b8   : > { %v5290_v24 = vpop.f32.mrb[1].mxu1 }
 0x3f1   : > { %v5292_v63 = vpop.f32.mrb[2].mxu1 }
 0x3f2   : > { %v5294_v1 = vpop.f32.mrb[3].mxu1 }
 0x3f5   : > { %v5296_v18 = vpop.f32.mrb[4].mxu1 }
 0x3f6   : > { %v5298_v19 = vpop.f32.mrb[5].mxu1 }
 0x3fc   : > { %v5300_v21 = vpop.f32.mrb[6].mxu1 }
 0x3fd   : > { %v5302_v3 = vpop.f32.mrb[7].mxu1 }
 0x404   : > { %v5304_v37 = vpop.f32.mrb[8].mxu1 }
 0x405   : > { %v5306_v45 = vpop.f32.mrb[9].mxu1 }
 0x428   : > { %v5308_v2 = vpop.f32.mrb[10].mxu1 }
 0x429   : > { %v5310_v46 = vpop.f32.mrb[11].mxu1 }
 0x42c   : > { %v5312_v11 = vpop.f32.mrb[12].mxu1 }
 0x42d   : > { %v5314_v40 = vpop.f32.mrb[13].mxu1 }
 0x430   : > { %v5316_v38 = vpop.f32.mrb[14].mxu1 }
 0x431   : > { %v5318_v4 = vpop.f32.mrb[15].mxu1 }
 0x434   : > { %v3775_v47 = vpop.f32.mrb[16].mxu1 }
 0x435   : > { %v1090_v6 = vpop.f32.mrb[17].mxu1  ;;  %v1170_v53 = vsel %vm286_vm2, %v3775_v47, -10000.0  ;;  %vm6503_vm2 = vcmp.le.s32.totalorder %v4918_v50, %v6502_v44 }
 0x436   : > { %1187 = vmax.xlane.f32.xlu1 %v1170_v53  ;;  %v1169_v17 = vsel %vm285_vm3, %v1090_v6, -10000.0 }
 0x437   : > { %1185 = vmax.xlane.f32.xlu0 %v1169_v17 }
 0x438   : > { %v3778_v22 = vpop.f32.mrb[18].mxu1 }
 0x439   : > { %v1100_v30 = vpop.f32.mrb[19].mxu1  ;;  %v1172_v9 = vsel %vm288_vm4, %v3778_v22, -10000.0 }
 0x43a   : > { %v1171_v49 = vsel %vm287_vm6, %v1100_v30, -10000.0  ;;  %v4497_v30 = vld [vmem:[%s4644_s28 + $0xc8] sm:$0xff] }
 0x43b   : > { %1191 = vmax.xlane.f32.xlu0 %v1172_v9 }
 0x43c   : > { %v3781_v32 = vpop.f32.mrb[20].mxu1 }
 0x43d   : > { %v1110_v10 = vpop.f32.mrb[21].mxu1  ;;  %v1174_v41 = vsel %vm290_vm8, %v3781_v32, -10000.0 }
 0x43e   : > { %v1173_v16 = vsel %vm289_vm5, %v1110_v10, -10000.0 }
 0x43f   : > { %1189 = vmax.xlane.f32.xlu0 %v1171_v49  ;;  %1193 = vmax.xlane.f32.xlu1 %v1173_v16 }
 0x440   : > { %v3784_v31 = vpop.f32.mrb[22].mxu1 }
 0x441   : > { %v1120_v42 = vpop.f32.mrb[23].mxu1  ;;  %v5347_v20 = vsel %vm292_vm10, %v3784_v31, -10000.0 }
 0x442   : > { %v5341_v43 = vsel %vm291_vm7, %v1120_v42, -10000.0 }
 0x443   : > { %1195 = vmax.xlane.f32.xlu0 %v1174_v41  ;;  %1197 = vmax.xlane.f32.xlu1 %v5341_v43 }
 0x444   : > { %v3787_v7 = vpop.f32.mrb[24].mxu1 }
 0x445   : > { %v1130_v52 = vpop.f32.mrb[25].mxu1  ;;  %v5359_v23 = vsel %vm294_vm12, %v3787_v7, -10000.0 }
 0x446   : > { %v5352_v36 = vsel %vm293_vm9, %v1130_v52, -10000.0 }
 0x447   : > { %1199 = vmax.xlane.f32.xlu0 %v5347_v20  ;;  %1201 = vmax.xlane.f32.xlu1 %v5352_v36 }
 0x448   : > { %v3790_v26 = vpop.f32.mrb[26].mxu1 }
 0x449   : > { %v1140_v33 = vpop.f32.mrb[27].mxu1  ;;  %v5377_v55 = vsel %vm296_vm14, %v3790_v26, -10000.0 }
 0x44a   : > { %v5371_v61 = vsel %vm6500_vm1, %v1140_v33, -10000.0 }
 0x44b   : > { %1203 = vmax.xlane.f32.xlu0 %v5359_v23 }
 0x44c   : > { %v3793_v56 = vpop.f32.mrb[28].mxu1 }
 0x44d   : > { %v1150_v25 = vpop.f32.mrb[29].mxu1  ;;  %v5389_v47 = vsel %vm298_vm11, %v3793_v56, -10000.0 }
 0x44e   : > { %v5382_v0 = vsel %vm6503_vm2, %v1150_v25, -10000.0 }
 0x450   : > { %v3796_v27 = vpop.f32.mrb[30].mxu1 }
 0x451   : > { %v1160_v29 = vpop.f32.mrb[31].mxu1  ;;  %v5401_v32 = vsel %vm300_vm13, %v3796_v27, -10000.0 }
 0x452   : > { %v5394_v22 = vsel %vm299_vm15, %v1160_v29, -10000.0 }
 0x458   : > { %4350 = vrot.lane.b32.xlu1 %v4349_v8, %s4567_s4 }
 0x461   : > { %4355 = vrot.lane.b32.xlu0 %v4354_v60, %s4567_s4 }
 0x47c   : > { %1205 = vmax.xlane.f32.xlu1 %v5371_v61 }
 0x480   : > { %1207 = vmax.xlane.f32.xlu0 %v5377_v55  ;;  %1209 = vmax.xlane.f32.xlu1 %v5382_v0 }
 0x484   : > { %1211 = vmax.xlane.f32.xlu0 %v5389_v47  ;;  %1213 = vmax.xlane.f32.xlu1 %v5394_v22 }
 0x488   : > { %1215 = vmax.xlane.f32.xlu0 %v5401_v32 }
 0x4c3   : > { %v1188_v10 = vpop.xlane.xlu1 %1187 }
 0x4c4   : > { %v1218_v12 = vsub.f32 %v1170_v53, %v1188_v10  ;;  %v1186_v13 = vpop.xlane.xlu0 %1185  ;;  %v4498_v10 = vld [vmem:[%s4644_s28 + $0xd8] sm:$0xff] }
 0x4c5   : > { %v1217_v31 = vsub.f32 %v1169_v17, %v1186_v13  ;;  %v4499_v13 = vld [vmem:[%s4644_s28 + $0xe8] sm:$0xff] }
 0x4c6   : > { %v1235_v34 = vmul.f32 1.442695, %v1218_v12  ;;  %v4359_v12 = vpack.i.bf16 %v4498_v10, %v4497_v30  ;;  %v236_v10 = vld [vmem:[%s6444_s1 + $0x118] sm:$0xff] }
 0x4c7   : > { %v1233_v42 = vmul.f32 1.442695, %v1217_v31  ;;  %v4500_v31 = vld [vmem:[%s4644_s28 + $0xf8] sm:$0xff]  ;;  %s3500_s28 = sshll.u32 %s4612_s16, 14 }
 0x4c8   : > { %4433 = vpow2.f32 %v1235_v34  ;;  %v1192_v39 = vpop.xlane.xlu0 %1191  ;;  %v4364_v34 = vpack.i.bf16 %v4500_v31, %v4499_v13  ;;  %v235_v31 = vld [vmem:[%s6444_s1 + $0x110] sm:$0xff]  ;;  %s6389_s5 = scalar_lea.hbm %s6446_s3, %s3500_s28 }
 0x4c9   : > { %4435 = vpow2.f32 %v1233_v42  ;;  %v1220_v7 = vsub.f32 %v1172_v9, %v1192_v39 }
 0x4cb   : > { %v1239_v57 = vmul.f32 1.442695, %v1220_v7 }
 0x4cc   : > { %v1190_v52 = vpop.xlane.xlu0 %1189  ;;  %v1194_v54 = vpop.xlane.xlu1 %1193 }
 0x4cd   : > { %4437 = vpow2.f32 %v1239_v57  ;;  %v1219_v51 = vsub.f32 %v1171_v49, %v1190_v52  ;;  %v1221_v50 = vsub.f32 %v1173_v16, %v1194_v54 }
 0x4cf   : > { %v1237_v26 = vmul.f32 1.442695, %v1219_v51  ;;  %v1241_v33 = vmul.f32 1.442695, %v1221_v50 }
 0x4d0   : > { %v1196_v56 = vpop.xlane.xlu0 %1195  ;;  %v1198_v25 = vpop.xlane.xlu1 %1197 }
 0x4d1   : > { %4439 = vpow2.f32 %v1237_v26  ;;  %v1222_v53 = vsub.f32 %v1174_v41, %v1196_v56  ;;  %v1223_v42 = vsub.f32 %v5341_v43, %v1198_v25 }
 0x4d2   : > { %v5404_v27 = vpop.eup %4433  ;;  %4441 = vpow2.f32 %v1241_v33 }
 0x4d3   : > { %v5406_v17 = vpop.eup %4435  ;;  %v1243_v29 = vmul.f32 1.442695, %v1222_v53  ;;  %1267 = vadd.xlane.f32.xlu0 %v5404_v27  ;;  %v1245_v7 = vmul.f32 1.442695, %v1223_v42 }
 0x4d4   : > { %v1200_v9 = vpop.xlane.xlu0 %1199  ;;  %v1202_v58 = vpop.xlane.xlu1 %1201  ;;  %1265 = vadd.xlane.f32.xlu1 %v5406_v17 }
 0x4d5   : > { %4443 = vpow2.f32 %v1243_v29  ;;  %v1224_v39 = vsub.f32 %v5347_v20, %v1200_v9  ;;  %v1225_v57 = vsub.f32 %v5352_v36, %v1202_v58 }
 0x4d6   : > { %4445 = vpow2.f32 %v1245_v7  ;;  %v260_v7 = vld [vmem:[%s6444_s1 + $0x1d8] sm:$0xff] }
 0x4d7   : > { %v5410_v49 = vpop.eup %4437  ;;  %v1247_v52 = vmul.f32 1.442695, %v1224_v39  ;;  %v1249_v51 = vmul.f32 1.442695, %v1225_v57  ;;  %v252_v39 = vld [vmem:[%s6444_s1 + $0x198] sm:$0xff] }
 0x4d8   : > { %v1204_v16 = vpop.xlane.xlu0 %1203  ;;  %v4351_v5 = vpop.permute.xlu1 %4350  ;;  %1271 = vadd.xlane.f32.xlu0 %v5410_v49  ;;  %v4025_v57 = vpack.c.bf16 %v260_v7, %v252_v39 }
 0x4d9   : > { %v4353_v41 = vunpack.i.h.bf16 %v4351_v5  ;;  %v4352_v8 = vunpack.i.l.bf16 %v4351_v5  ;;  %v1226_v54 = vsub.f32 %v5359_v23, %v1204_v16  ;;  %4447 = vpow2.f32 %v1247_v52  ;;  %v251_v52 = vld [vmem:[%s6444_s1 + $0x190] sm:$0xff] }
 0x4da   : > { %4449 = vpow2.f32 %v1249_v51 }
 0x4db   : > { %v5413_v14 = vpop.eup %4439  ;;  %v3997_v59 = vpack.c.bf16 %v4353_v41, %v4352_v8  ;;  %v1251_v26 = vmul.f32 1.442695, %v1226_v54  ;;  %v259_v54 = vld [vmem:[%s6444_s1 + $0x1d0] sm:$0xff] }
 0x4dc   : > { %v4356_v60 = vpop.permute.xlu0 %4355  ;;  %1269 = vadd.xlane.f32.xlu1 %v5413_v14  ;;  %v5416_v44 = vpop.eup %4441  ;;  %v4027_v51 = vpack.c.bf16 %v259_v54, %v251_v52  ;;  %v257_v52 = vld [vmem:[%s6444_s1 + $0x1c0] sm:$0xff] }
 0x4dd   : > { %v4358_v28 = vunpack.i.h.bf16 %v4356_v60  ;;  %v4357_v62 = vunpack.i.l.bf16 %v4356_v60  ;;  %3998 = vmatprep.subr.bf16.mxu0 %v3997_v59  ;;  %4451 = vpow2.f32 %v1251_v26 }
 0x4de   : > { %4000 = vmatpush3.bf16.msra.mxu0 %v3997_v59 }
 0x4df   : > { %v5418_v15 = vpop.eup %4443  ;;  %v4001_v6 = vpack.c.bf16 %v4358_v28, %v4357_v62 }
 0x4e0   : > { %1275 = vadd.xlane.f32.xlu0 %v5418_v15  ;;  %1273 = vadd.xlane.f32.xlu1 %v5416_v44 }
 0x4e1   : > { %4002 = vmatprep.subr.bf16.mxu0 %v4001_v6 }
 0x4e2   : > { %4004 = vmatpush3.bf16.msra.mxu0 %v4001_v6 }
 0x4f1   : > { %4360 = vrot.lane.b32.xlu1 %v4359_v12, %s4567_s4  ;;  %v244_v12 = vld [vmem:[%s6444_s1 + $0x158] sm:$0xff] }
 0x4f2   : > { %v4021_v13 = vpack.c.bf16 %v244_v12, %v236_v10  ;;  %v241_v10 = vld [vmem:[%s6444_s1 + $0x140] sm:$0xff] }
 0x4f4   : > { %4022 = vmatprep.subr.bf16.mxu1 %v4021_v13  ;;  %v250_v13 = vld [vmem:[%s6444_s1 + $0x188] sm:$0xff] }
 0x4f6   : > { %4365 = vrot.lane.b32.xlu0 %v4364_v34, %s4567_s4  ;;  %v243_v34 = vld [vmem:[%s6444_s1 + $0x150] sm:$0xff] }
 0x4f7   : > { %v4023_v42 = vpack.c.bf16 %v243_v34, %v235_v31  ;;  %v258_v31 = vld [vmem:[%s6444_s1 + $0x1c8] sm:$0xff] }
 0x4f8   : > { %v4017_v7 = vpack.c.bf16 %v258_v31, %v250_v13 }
 0x4f9   : > { %4024 = vmatpush1.bf16.msra.mxu1 %v4023_v42 }
 0x4fa   : > { %4026 = vmatprep.subr.bf16.mxu1 %v4025_v57  ;;  %v249_v57 = vld [vmem:[%s6444_s1 + $0x180] sm:$0xff] }
 0x4fd   : > { %4028 = vmatpush1.bf16.msra.mxu1 %v4027_v51 }
 0x509   : > { %v1206_v50 = vpop.xlane.xlu1 %1205 }
 0x50a   : > { %v1227_v33 = vsub.f32 %v5371_v61, %v1206_v50  ;;  %v5437_v61 = vpop.eup %4445 }
 0x50b   : > { %v5439_v5 = vpop.eup %4447 }
 0x50c   : > { %v1253_v56 = vmul.f32 1.442695, %v1227_v33  ;;  %v5444_v59 = vpop.eup %4449 }
 0x50d   : > { %v1208_v53 = vpop.xlane.xlu0 %1207  ;;  %v1210_v29 = vpop.xlane.xlu1 %1209 }
 0x50e   : > { %v1228_v43 = vsub.f32 %v5377_v55, %v1208_v53  ;;  %v1229_v20 = vsub.f32 %v5382_v0, %v1210_v29  ;;  %4453 = vpow2.f32 %v1253_v56 }
 0x510   : > { %v1255_v36 = vmul.f32 1.442695, %v1228_v43  ;;  %v1257_v25 = vmul.f32 1.442695, %v1229_v20 }
 0x511   : > { %v1212_v23 = vpop.xlane.xlu0 %1211  ;;  %v1214_v9 = vpop.xlane.xlu1 %1213 }
 0x512   : > { %4455 = vpow2.f32 %v1255_v36  ;;  %v1230_v58 = vsub.f32 %v5389_v47, %v1212_v23  ;;  %v1231_v16 = vsub.f32 %v5394_v22, %v1214_v9  ;;  %v5446_v47 = vpop.eup %4451 }
 0x513   : > { %4457 = vpow2.f32 %v1257_v25 }
 0x514   : > { %v1259_v41 = vmul.f32 1.442695, %v1230_v58  ;;  %v1261_v8 = vmul.f32 1.442695, %v1231_v16 }
 0x515   : > { %1279 = vadd.xlane.f32.xlu0 %v5439_v5  ;;  %v1216_v55 = vpop.xlane.xlu0 %1215  ;;  %1277 = vadd.xlane.f32.xlu1 %v5437_v61 }
 0x516   : > { %4459 = vpow2.f32 %v1259_v41  ;;  %v1232_v0 = vsub.f32 %v5401_v32, %v1216_v55 }
 0x517   : > { %4461 = vpow2.f32 %v1261_v8  ;;  %v234_v8 = vld [vmem:[%s6444_s1 + $0x108] sm:$0xff] }
 0x518   : > { %v1263_v22 = vmul.f32 1.442695, %v1232_v0  ;;  %v5450_v60 = vpop.eup %4453 }
 0x519   : > { %1283 = vadd.xlane.f32.xlu0 %v5446_v47  ;;  %1281 = vadd.xlane.f32.xlu1 %v5444_v59 }
 0x51a   : > { %4463 = vpow2.f32 %v1263_v22  ;;  %v233_v22 = vld [vmem:[%s6444_s1 + $0x100] sm:$0xff] }
 0x51b   : > { %v4015_v42 = vpack.c.bf16 %v241_v10, %v233_v22 }
 0x51c   : > { %v5452_v28 = vpop.eup %4455 }
 0x51d   : > { %1287 = vadd.xlane.f32.xlu0 %v5452_v28  ;;  %1285 = vadd.xlane.f32.xlu1 %v5450_v60  ;;  %v5456_v32 = vpop.eup %4457 }
 0x520   : > { %v5458_v62 = vpop.eup %4459 }
 0x521   : > { %1291 = vadd.xlane.f32.xlu0 %v5458_v62  ;;  %1289 = vadd.xlane.f32.xlu1 %v5456_v32  ;;  %v5462_v6 = vpop.eup %4461 }
 0x524   : > { %v5464_v30 = vpop.eup %4463 }
 0x525   : > { %1295 = vadd.xlane.f32.xlu0 %v5464_v30  ;;  %1293 = vadd.xlane.f32.xlu1 %v5462_v6 }
 0x560   : > { %v1268_v26 = vpop.xlane.xlu0 %1267 }
 0x561   : > { %v1266_v50 = vpop.xlane.xlu1 %1265 }
 0x562   : > { %4465 = vrcp.f32 %v1266_v50 }
 0x563   : > { %4467 = vrcp.f32 %v1268_v26  ;;  %v4019_v26 = vpack.c.bf16 %v257_v52, %v249_v57  ;;  %v237_v57 = vld [vmem:[%s6444_s1 + $0x120] sm:$0xff] }
 0x564   : > { %v245_v52 = vld [vmem:[%s6444_s1 + $0x160] sm:$0xff] }
 0x565   : > { %v1272_v33 = vpop.xlane.xlu0 %1271 }
 0x569   : > { %v1270_v56 = vpop.xlane.xlu1 %1269 }
 0x56a   : > { %4469 = vrcp.f32 %v1270_v56 }
 0x56b   : > { %4471 = vrcp.f32 %v1272_v33 }
 0x56c   : > { %v4466_v53 = vpop.eup %4465 }
 0x56d   : > { %v1276_v29 = vpop.xlane.xlu0 %1275  ;;  %v1274_v43 = vpop.xlane.xlu1 %1273  ;;  %v1313_v20 = vmul.f32 %v4466_v53, %v5406_v17  ;;  %v242_v17 = vld [vmem:[%s6444_s1 + $0x148] sm:$0xff] }
 0x56e   : > { %4473 = vrcp.f32 %v1274_v43  ;;  %v4013_v0 = vpack.c.bf16 %v242_v17, %v234_v8  ;;  %v4468_v12 = vpop.eup %4467 }
 0x56f   : > { %3829 = vmatprep.mubr.f32.mxu0 %v1313_v20  ;;  %4475 = vrcp.f32 %v1276_v29  ;;  %v1314_v39 = vmul.f32 %v4468_v12, %v5404_v27 }
 0x571   : > { %v4366_v36 = vpop.permute.xlu0 %4365  ;;  %v4361_v25 = vpop.permute.xlu1 %4360 }
 0x572   : > { %v4368_v23 = vunpack.i.h.bf16 %v4366_v36  ;;  %v4367_v9 = vunpack.i.l.bf16 %v4366_v36  ;;  %v4363_v58 = vunpack.i.h.bf16 %v4361_v25  ;;  %v4362_v16 = vunpack.i.l.bf16 %v4361_v25 }
 0x574   : > { %v4005_v41 = vpack.c.bf16 %v4363_v58, %v4362_v16  ;;  %v4009_v55 = vpack.c.bf16 %v4368_v23, %v4367_v9  ;;  %v4470_v34 = vpop.eup %4469 }
 0x575   : > { %v4472_v54 = vpop.eup %4471  ;;  %v1315_v51 = vmul.f32 %v4470_v34, %v5413_v14 }
 0x576   : > { %4006 = vmatprep.subr.bf16.mxu0 %v4005_v41  ;;  %v1316_v27 = vmul.f32 %v4472_v54, %v5410_v49  ;;  %v239_v54 = vld [vmem:[%s6444_s1 + $0x130] sm:$0xff] }
 0x577   : > { %4008 = vmatpush3.bf16.msra.mxu0 %v4005_v41 }
 0x578   : > { %4010 = vmatprep.subr.bf16.mxu0 %v4009_v55  ;;  %v4474_v50 = vpop.eup %4473 }
 0x579   : > { %v4476_v33 = vpop.eup %4475  ;;  %v1317_v56 = vmul.f32 %v4474_v50, %v5416_v44  ;;  %v254_v50 = vld [vmem:[%s6444_s1 + $0x1a8] sm:$0xff] }
 0x57a   : > { %v1318_v53 = vmul.f32 %v4476_v33, %v5418_v15  ;;  %v264_v33 = vld [vmem:[%s6444_s1 + $0x1f8] sm:$0xff] }
 0x57b   : > { %4012 = vmatpush3.bf16.msra.mxu0 %v4009_v55 }
 0x57c   : > { %4014 = vmatprep.subr.bf16.mxu0 %v4013_v0 }
 0x57e   : > { %3830 = vmatmul.mubr.f32.vlgmr.msra.gmra.mrb[16].mxu0 %v1314_v39 }
 0x57f   : > { %3832 = vmatprep.mubr.f32.mxu0 %v1315_v51  ;;  %4016 = vmatpush1.bf16.msra.mxu0 %v4015_v42  ;;  %v247_v51 = vld [vmem:[%s6444_s1 + $0x170] sm:$0xff] }
 0x580   : > { %4018 = vmatprep.subr.bf16.mxu0 %v4017_v7 }
 0x582   : > { %3833 = vmatmul.mubr.f32.gmra.mrb[18].mxu0 %v1316_v27  ;;  %v256_v27 = vld [vmem:[%s6444_s1 + $0x1b8] sm:$0xff] }
 0x583   : > { %3835 = vmatprep.mubr.f32.mxu0 %v1317_v56  ;;  %4020 = vmatpush1.bf16.msra.mxu0 %v4019_v26  ;;  %v262_v26 = vld [vmem:[%s6444_s1 + $0x1e8] sm:$0xff] }
 0x586   : > { %3836 = vmatmul.mubr.f32.gmra.mrb[20].mxu0 %v1318_v53  ;;  %v4031_v53 = vpack.c.bf16 %v245_v52, %v237_v57  ;;  %v220_v57 = vld [vmem:[%s6444_s1 + $0x98] sm:$0xff] }
 0x587   : > { %v228_v52 = vld [vmem:[%s6444_s1 + $0xd8] sm:$0xff] }
 0x5a2   : > { %v1280_v29 = vpop.xlane.xlu0 %1279  ;;  %v1278_v43 = vpop.xlane.xlu1 %1277 }
 0x5a3   : > { %4477 = vrcp.f32 %v1280_v29  ;;  %v4039_v29 = vpack.c.bf16 %v247_v51, %v239_v54 }
 0x5a4   : > { %4479 = vrcp.f32 %v1278_v43  ;;  %v253_v43 = vld [vmem:[%s6444_s1 + $0x1a0] sm:$0xff] }
 0x5a6   : > { %v1284_v14 = vpop.xlane.xlu0 %1283  ;;  %v1282_v20 = vpop.xlane.xlu1 %1281 }
 0x5a7   : > { %4481 = vrcp.f32 %v1284_v14  ;;  %v261_v14 = vld [vmem:[%s6444_s1 + $0x1e0] sm:$0xff] }
 0x5a8   : > { %4483 = vrcp.f32 %v1282_v20 }
 0x5aa   : > { %v1288_v36 = vpop.xlane.xlu0 %1287  ;;  %v1286_v49 = vpop.xlane.xlu1 %1285 }
 0x5ab   : > { %4485 = vrcp.f32 %v1288_v36  ;;  %v4033_v36 = vpack.c.bf16 %v262_v26, %v254_v50  ;;  %v217_v50 = vld [vmem:[%s6444_s1 + $0x80] sm:$0xff] }
 0x5ac   : > { %4487 = vrcp.f32 %v1286_v49  ;;  %v4041_v49 = vpack.c.bf16 %v264_v33, %v256_v27  ;;  %v225_v26 = vld [vmem:[%s6444_s1 + $0xc0] sm:$0xff]  ;;  %v4057_v33 = vpack.c.bf16 %v228_v52, %v220_v57 }
 0x5ad   : > { %v4478_v25 = vpop.eup %4477 }
 0x5ae   : > { %v4480_v44 = vpop.eup %4479  ;;  %v1292_v23 = vpop.xlane.xlu0 %1291  ;;  %v1320_v58 = vmul.f32 %v4478_v25, %v5439_v5  ;;  %v255_v25 = vld [vmem:[%s6444_s1 + $0x1b0] sm:$0xff] }
 0x5af   : > { %v1290_v9 = vpop.xlane.xlu1 %1289  ;;  %4489 = vrcp.f32 %v1292_v23  ;;  %v1319_v15 = vmul.f32 %v4480_v44, %v5437_v61  ;;  %v263_v44 = vld [vmem:[%s6444_s1 + $0x1f0] sm:$0xff]  ;;  %v202_v23 = vld [vmem:[%s6444_s1 + $0x8] sm:$0xff] }
 0x5b0   : > { %4491 = vrcp.f32 %v1290_v9  ;;  %v210_v9 = vld [vmem:[%s6444_s1 + $0x48] sm:$0xff] }
 0x5b1   : > { %v4482_v16 = vpop.eup %4481  ;;  %3838 = vmatprep.mubr.f32.mxu0 %v1319_v15  ;;  %v212_v15 = vld [vmem:[%s6444_s1 + $0x58] sm:$0xff] }
 0x5b2   : > { %v4484_v41 = vpop.eup %4483  ;;  %3839 = vmatmul.mubr.f32.gmra.mrb[22].mxu0 %v1320_v58  ;;  %v1296_v8 = vpop.xlane.xlu0 %1295  ;;  %v1322_v55 = vmul.f32 %v4482_v16, %v5446_v47  ;;  %v204_v58 = vld [vmem:[%s6444_s1 + $0x18] sm:$0xff] }
 0x5b3   : > { %v1294_v17 = vpop.xlane.xlu1 %1293  ;;  %4493 = vrcp.f32 %v1296_v8  ;;  %v1321_v0 = vmul.f32 %v4484_v41, %v5444_v59  ;;  %v4035_v41 = vpack.c.bf16 %v261_v14, %v253_v43  ;;  %v4043_v8 = vpack.c.bf16 %v263_v44, %v255_v25  ;;  %v206_v43 = vld [vmem:[%s6444_s1 + $0x28] sm:$0xff] }
 0x5b4   : > { %4495 = vrcp.f32 %v1294_v17  ;;  %v214_v14 = vld [vmem:[%s6444_s1 + $0x68] sm:$0xff]  ;;  %v4051_v25 = vpack.c.bf16 %v225_v26, %v217_v50 }
 0x5b5   : > { %v4486_v22 = vpop.eup %4485  ;;  %3841 = vmatprep.mubr.f32.mxu0 %v1321_v0  ;;  %v4053_v0 = vpack.c.bf16 %v212_v15, %v204_v58  ;;  %v4061_v44 = vpack.c.bf16 %v214_v14, %v206_v43  ;;  %v207_v58 = vld [vmem:[%s6444_s1 + $0x30] sm:$0xff] }
 0x5b6   : > { %v4488_v10 = vpop.eup %4487  ;;  %3842 = vmatmul.mubr.f32.gmra.mrb[24].mxu0 %v1322_v55  ;;  %v1324_v5 = vmul.f32 %v4486_v22, %v5452_v28  ;;  %v4568_v28 = vmov 0.0   ;;  %v4045_v55 = vpack.c.bf16 %v210_v9, %v202_v23  ;;  %v213_v9 = vld [vmem:[%s6444_s1 + $0x60] sm:$0xff]  ;;  %v215_v15 = vld [vmem:[%s6444_s1 + $0x70] sm:$0xff] }
 0x5b7   : > { %v1323_v61 = vmul.f32 %v4488_v10, %v5450_v60  ;;  %1811 = vmatprep.mubr.f32.mxu1 %v4568_v28  ;;  %v238_v60 = vld [vmem:[%s6444_s1 + $0x128] sm:$0xff] }
 0x5b9   : > { %v4490_v12 = vpop.eup %4489  ;;  %3844 = vmatprep.mubr.f32.mxu0 %v1323_v61 }
 0x5ba   : > { %v4492_v13 = vpop.eup %4491  ;;  %3845 = vmatmul.mubr.f32.gmra.mrb[26].mxu0 %v1324_v5  ;;  %v1326_v31 = vmul.f32 %v4490_v12, %v5458_v62  ;;  %v240_v62 = vld [vmem:[%s6444_s1 + $0x138] sm:$0xff] }
 0x5bb   : > { %v1325_v47 = vmul.f32 %v4492_v13, %v5456_v32  ;;  %v246_v32 = vld [vmem:[%s6444_s1 + $0x168] sm:$0xff] }
 0x5bd   : > { %v4494_v34 = vpop.eup %4493  ;;  %3847 = vmatprep.mubr.f32.mxu0 %v1325_v47 }
 0x5be   : > { %v4496_v59 = vpop.eup %4495  ;;  %3848 = vmatmul.mubr.f32.gmra.mrb[28].mxu0 %v1326_v31  ;;  %v1328_v42 = vmul.f32 %v4494_v34, %v5464_v30  ;;  %v248_v30 = vld [vmem:[%s6444_s1 + $0x178] sm:$0xff] }
 0x5bf   : > { %v1327_v39 = vmul.f32 %v4496_v59, %v5462_v6  ;;  %v4029_v6 = vpack.c.bf16 %v246_v32, %v238_v60  ;;  %v4037_v7 = vpack.c.bf16 %v248_v30, %v240_v62  ;;  %v201_v60 = vld [vmem:[%s6444_s1] sm:$0xff]  ;;  %v203_v62 = vld [vmem:[%s6444_s1 + $0x10] sm:$0xff]  ;;  %v218_v30 = vld [vmem:[%s6444_s1 + $0x88] sm:$0xff] }
 0x5c0   : > { %v209_v32 = vld [vmem:[%s6444_s1 + $0x40] sm:$0xff] }
 0x5c1   : > { %3850 = vmatprep.mubr.f32.mxu0 %v1327_v39  ;;  %4030 = vmatprep.subr.bf16.mxu0 %v4029_v6  ;;  %v211_v6 = vld [vmem:[%s6444_s1 + $0x50] sm:$0xff]  ;;  %v4047_v54 = vpack.c.bf16 %v209_v32, %v201_v60 }
 0x5c2   : > { %3851 = vmatmul.mubr.f32.gmra.mrb[30].mxu0 %v1328_v42  ;;  %4038 = vmatprep.subr.bf16.mxu1 %v4037_v7  ;;  %v226_v7 = vld [vmem:[%s6444_s1 + $0xc8] sm:$0xff]  ;;  %v4055_v51 = vpack.c.bf16 %v211_v6, %v203_v62 }
 0x5c3   : > { %1650 = vmatprep.mubr.f32.mxu0 %v4568_v28  ;;  %v4049_v27 = vpack.c.bf16 %v226_v7, %v218_v30 }
 0x651   : > { %v5570_v56 = vpop.f32.mrb[16].mxu0 }
 0x652   : > { %v5578_v20 = vpop.f32.mrb[17].mxu0 }
 0x653   : > { %3366 = vmatmul.mubr.msk.f32.vlgmr.msra.gmra.mrb[32].mxu0 %vm365_vm0, %v5578_v20  ;;  %3382 = vmatmul.mubr.msk.f32.vlgmr.msra.gmra.mrb[32].mxu1 %vm365_vm0, %v5578_v20 }
 0x654   : > { %1656 = vmatprep.mubr.f32.mxu0 %v4568_v28  ;;  %1817 = vmatprep.mubr.f32.mxu1 %v4568_v28 }
 0x655   : > { %v5604_v16 = vpop.f32.mrb[18].mxu0  ;;  %4032 = vmatpush1.bf16.msra.mxu0 %v4031_v53  ;;  %4040 = vmatpush1.bf16.msra.mxu1 %v4039_v29  ;;  %v219_v53 = vld [vmem:[%s6444_s1 + $0x90] sm:$0xff] }
 0x656   : > { %v5606_v17 = vpop.f32.mrb[19].mxu0  ;;  %4034 = vmatprep.subr.bf16.mxu0 %v4033_v36  ;;  %4042 = vmatprep.subr.bf16.mxu1 %v4041_v49  ;;  %v227_v29 = vld [vmem:[%s6444_s1 + $0xd0] sm:$0xff]  ;;  %v208_v36 = vld [vmem:[%s6444_s1 + $0x38] sm:$0xff] }
 0x657   : > { %3367 = vmatmul.mubr.msk.f32.gmra.mrb[34].mxu0 %vm365_vm0, %v5570_v56  ;;  %3383 = vmatmul.mubr.msk.f32.gmra.mrb[34].mxu1 %vm365_vm0, %v5570_v56  ;;  %v216_v49 = vld [vmem:[%s6444_s1 + $0x78] sm:$0xff] }
 0x658   : > { %1662 = vmatprep.mubr.f32.mxu0 %v4568_v28  ;;  %1823 = vmatprep.mubr.f32.mxu1 %v4568_v28  ;;  %v4069_v23 = vpack.c.bf16 %v216_v49, %v208_v36 }
 0x659   : > { %v5614_v22 = vpop.f32.mrb[20].mxu0  ;;  %4036 = vmatpush1.bf16.msra.mxu0 %v4035_v41  ;;  %4044 = vmatpush1.bf16.msra.mxu1 %v4043_v8  ;;  %v230_v41 = vld [vmem:[%s6444_s1 + $0xe8] sm:$0xff]  ;;  %v224_v8 = vld [vmem:[%s6444_s1 + $0xb8] sm:$0xff] }
 0x65a   : > { %v5616_v10 = vpop.f32.mrb[21].mxu0  ;;  %4046 = vmatprep.subr.bf16.mxu0 %v4045_v55  ;;  %4054 = vmatprep.subr.bf16.mxu1 %v4053_v0  ;;  %v4071_v0 = vpack.c.bf16 %v215_v15, %v207_v58 }
 0x65b   : > { %3368 = vmatmul.mubr.msk.f32.gmra.mrb[36].mxu0 %vm365_vm0, %v5606_v17  ;;  %3384 = vmatmul.mubr.msk.f32.gmra.mrb[36].mxu1 %vm365_vm0, %v5606_v17 }
 0x65c   : > { %1668 = vmatprep.mubr.f32.mxu0 %v4568_v28  ;;  %1829 = vmatprep.mubr.f32.mxu1 %v4568_v28 }
 0x65f   : > { %3369 = vmatmul.mubr.msk.f32.gmra.mrb[38].mxu0 %vm365_vm0, %v5604_v16  ;;  %3385 = vmatmul.mubr.msk.f32.gmra.mrb[38].mxu1 %vm365_vm0, %v5604_v16 }
 0x660   : > { %1674 = vmatprep.mubr.f32.mxu0 %v4568_v28  ;;  %1835 = vmatprep.mubr.f32.mxu1 %v4568_v28 }
 0x663   : > { %3370 = vmatmul.mubr.msk.f32.gmra.mrb[40].mxu0 %vm365_vm0, %v5616_v10  ;;  %3386 = vmatmul.mubr.msk.f32.gmra.mrb[40].mxu1 %vm365_vm0, %v5616_v10 }
 0x664   : > { %1680 = vmatprep.mubr.f32.mxu0 %v4568_v28  ;;  %1841 = vmatprep.mubr.f32.mxu1 %v4568_v28 }
 0x667   : > { %3371 = vmatmul.mubr.msk.f32.gmra.mrb[42].mxu0 %vm365_vm0, %v5614_v22  ;;  %3387 = vmatmul.mubr.msk.f32.gmra.mrb[42].mxu1 %vm365_vm0, %v5614_v22 }
 0x668   : > { %1686 = vmatprep.mubr.f32.mxu0 %v4568_v28  ;;  %1847 = vmatprep.mubr.f32.mxu1 %v4568_v28 }
 0x685   : > { %v5642_v5 = vpop.f32.mrb[22].mxu0 }
 0x686   : > { %v5644_v61 = vpop.f32.mrb[23].mxu0 }
 0x687   : > { %3372 = vmatmul.mubr.msk.f32.gmra.mrb[44].mxu0 %vm365_vm0, %v5644_v61  ;;  %3388 = vmatmul.mubr.msk.f32.gmra.mrb[44].mxu1 %vm365_vm0, %v5644_v61 }
 0x688   : > { %1692 = vmatprep.mubr.f32.mxu0 %v4568_v28  ;;  %1853 = vmatprep.mubr.f32.mxu1 %v4568_v28 }
 0x689   : > { %v5652_v12 = vpop.f32.mrb[24].mxu0 }
 0x68a   : > { %v5654_v13 = vpop.f32.mrb[25].mxu0 }
 0x68b   : > { %3373 = vmatmul.mubr.msk.f32.gmra.mrb[46].mxu0 %vm365_vm0, %v5642_v5  ;;  %3389 = vmatmul.mubr.msk.f32.gmra.mrb[46].mxu1 %vm365_vm0, %v5642_v5 }
 0x68c   : > { %1698 = vmatprep.mubr.f32.mxu0 %v4568_v28  ;;  %1859 = vmatprep.mubr.f32.mxu1 %v4568_v28 }
 0x68d   : > { %v5662_v31 = vpop.f32.mrb[26].mxu0 }
 0x68e   : > { %v5664_v47 = vpop.f32.mrb[27].mxu0 }
 0x68f   : > { %3374 = vmatmul.mubr.msk.f32.gmra.mrb[48].mxu0 %vm365_vm0, %v5654_v13  ;;  %3390 = vmatmul.mubr.msk.f32.gmra.mrb[48].mxu1 %vm365_vm0, %v5654_v13 }
 0x690   : > { %1704 = vmatprep.mubr.f32.mxu0 %v4568_v28  ;;  %1865 = vmatprep.mubr.f32.mxu1 %v4568_v28 }
 0x691   : > { %v5672_v34 = vpop.f32.mrb[28].mxu0 }
 0x692   : > { %v5674_v59 = vpop.f32.mrb[29].mxu0 }
 0x693   : > { %3375 = vmatmul.mubr.msk.f32.gmra.mrb[50].mxu0 %vm365_vm0, %v5652_v12  ;;  %3391 = vmatmul.mubr.msk.f32.gmra.mrb[50].mxu1 %vm365_vm0, %v5652_v12 }
 0x694   : > { %1710 = vmatprep.mubr.f32.mxu0 %v4568_v28  ;;  %1871 = vmatprep.mubr.f32.mxu1 %v4568_v28 }
 0x695   : > { %v5682_v42 = vpop.f32.mrb[30].mxu0 }
 0x696   : > { %v5684_v39 = vpop.f32.mrb[31].mxu0 }
 0x697   : > { %3376 = vmatmul.mubr.msk.f32.gmra.mrb[52].mxu0 %vm365_vm0, %v5664_v47  ;;  %3392 = vmatmul.mubr.msk.f32.gmra.mrb[52].mxu1 %vm365_vm0, %v5664_v47 }
 0x698   : > { %1716 = vmatprep.mubr.f32.mxu0 %v4568_v28  ;;  %1877 = vmatprep.mubr.f32.mxu1 %v4568_v28 }
 0x69b   : > { %3377 = vmatmul.mubr.msk.f32.gmra.mrb[54].mxu0 %vm365_vm0, %v5662_v31  ;;  %3393 = vmatmul.mubr.msk.f32.gmra.mrb[54].mxu1 %vm365_vm0, %v5662_v31 }
 0x69c   : > { %1722 = vmatprep.mubr.f32.mxu0 %v4568_v28  ;;  %1883 = vmatprep.mubr.f32.mxu1 %v4568_v28 }
 0x69f   : > { %3378 = vmatmul.mubr.msk.f32.gmra.mrb[56].mxu0 %vm365_vm0, %v5674_v59  ;;  %3394 = vmatmul.mubr.msk.f32.gmra.mrb[56].mxu1 %vm365_vm0, %v5674_v59 }
 0x6a0   : > { %1728 = vmatprep.mubr.f32.mxu0 %v4568_v28  ;;  %1889 = vmatprep.mubr.f32.mxu1 %v4568_v28 }
 0x6a3   : > { %3379 = vmatmul.mubr.msk.f32.gmra.mrb[58].mxu0 %vm365_vm0, %v5672_v34  ;;  %3395 = vmatmul.mubr.msk.f32.gmra.mrb[58].mxu1 %vm365_vm0, %v5672_v34 }
 0x6a4   : > { %1734 = vmatprep.mubr.f32.mxu0 %v4568_v28  ;;  %1895 = vmatprep.mubr.f32.mxu1 %v4568_v28 }
 0x6a7   : > { %3380 = vmatmul.mubr.msk.f32.gmra.mrb[60].mxu0 %vm365_vm0, %v5684_v39  ;;  %3396 = vmatmul.mubr.msk.f32.gmra.mrb[60].mxu1 %vm365_vm0, %v5684_v39 }
 0x6a8   : > { %1740 = vmatprep.mubr.f32.mxu0 %v4568_v28  ;;  %1901 = vmatprep.mubr.f32.mxu1 %v4568_v28 }
 0x6ab   : > { %3381 = vmatmul.mubr.msk.f32.gmra.mrb[62].mxu0 %vm365_vm0, %v5682_v42  ;;  %3397 = vmatmul.mubr.msk.f32.gmra.mrb[62].mxu1 %vm365_vm0, %v5682_v42 }
 0x6ac   : > { %1972 = vmatprep.mubr.f32.mxu0 %v4568_v28  ;;  %2133 = vmatprep.mubr.f32.mxu1 %v4568_v28 }
 0x6af   : > { %3398 = vmatmul.mubr.msk.f32.vlgmr.msra.gmra.mrb[64].mxu0 %vm365_vm0, %v5578_v20  ;;  %3414 = vmatmul.mubr.msk.f32.vlgmr.msra.gmra.mrb[64].mxu1 %vm365_vm0, %v5578_v20  ;;  %v4059_v20 = vpack.c.bf16 %v227_v29, %v219_v53 }
 0x6b0   : > { %4048 = vmatpush1.bf16.msra.mxu0 %v4047_v54  ;;  %4056 = vmatpush1.bf16.msra.mxu1 %v4055_v51 }
 0x6b1   : > { %1978 = vmatprep.mubr.f32.mxu0 %v4568_v28  ;;  %2139 = vmatprep.mubr.f32.mxu1 %v4568_v28 }
 0x6b2   : > { %4050 = vmatprep.subr.bf16.mxu0 %v4049_v27  ;;  %4058 = vmatprep.subr.bf16.mxu1 %v4057_v33 }
 0x6b3   : > { %3399 = vmatmul.mubr.msk.f32.gmra.mrb[66].mxu0 %vm365_vm0, %v5570_v56  ;;  %3415 = vmatmul.mubr.msk.f32.gmra.mrb[66].mxu1 %vm365_vm0, %v5570_v56  ;;  %v205_v56 = vld [vmem:[%s6444_s1 + $0x20] sm:$0xff] }
 0x6b4   : > { %1984 = vmatprep.mubr.f32.mxu0 %v4568_v28  ;;  %2145 = vmatprep.mubr.f32.mxu1 %v4568_v28  ;;  %v4063_v55 = vpack.c.bf16 %v213_v9, %v205_v56 }
 0x6b5   : > { %4052 = vmatpush1.bf16.msra.mxu0 %v4051_v25  ;;  %4060 = vmatpush1.bf16.msra.mxu1 %v4059_v20 }
 0x6b6   : > { %4062 = vmatprep.subr.bf16.mxu0 %v4061_v44  ;;  %4070 = vmatprep.subr.bf16.mxu1 %v4069_v23 }
 0x6b7   : > { %3400 = vmatmul.mubr.msk.f32.gmra.mrb[68].mxu0 %vm365_vm0, %v5606_v17  ;;  %3416 = vmatmul.mubr.msk.f32.gmra.mrb[68].mxu1 %vm365_vm0, %v5606_v17  ;;  %v232_v17 = vld [vmem:[%s6444_s1 + $0xf8] sm:$0xff] }
 0x6b8   : > { %1990 = vmatprep.mubr.f32.mxu0 %v4568_v28  ;;  %2151 = vmatprep.mubr.f32.mxu1 %v4568_v28 }
 0x6bb   : > { %3401 = vmatmul.mubr.msk.f32.gmra.mrb[70].mxu0 %vm365_vm0, %v5604_v16  ;;  %3417 = vmatmul.mubr.msk.f32.gmra.mrb[70].mxu1 %vm365_vm0, %v5604_v16  ;;  %v222_v16 = vld [vmem:[%s6444_s1 + $0xa8] sm:$0xff] }
 0x6bc   : > { %1996 = vmatprep.mubr.f32.mxu0 %v4568_v28  ;;  %2157 = vmatprep.mubr.f32.mxu1 %v4568_v28 }
 0x6bf   : > { %3402 = vmatmul.mubr.msk.f32.gmra.mrb[72].mxu0 %vm365_vm0, %v5616_v10  ;;  %3418 = vmatmul.mubr.msk.f32.gmra.mrb[72].mxu1 %vm365_vm0, %v5616_v10  ;;  %v4065_v10 = vpack.c.bf16 %v230_v41, %v222_v16 }
 0x6c0   : > { %2002 = vmatprep.mubr.f32.mxu0 %v4568_v28  ;;  %2163 = vmatprep.mubr.f32.mxu1 %v4568_v28 }
 0x6c3   : > { %3403 = vmatmul.mubr.msk.f32.gmra.mrb[74].mxu0 %vm365_vm0, %v5614_v22  ;;  %3419 = vmatmul.mubr.msk.f32.gmra.mrb[74].mxu1 %vm365_vm0, %v5614_v22  ;;  %v221_v22 = vld [vmem:[%s6444_s1 + $0xa0] sm:$0xff] }
 0x6c4   : > { %2008 = vmatprep.mubr.f32.mxu0 %v4568_v28  ;;  %2169 = vmatprep.mubr.f32.mxu1 %v4568_v28 }
 0x6c7   : > { %3404 = vmatmul.mubr.msk.f32.gmra.mrb[76].mxu0 %vm365_vm0, %v5644_v61  ;;  %3420 = vmatmul.mubr.msk.f32.gmra.mrb[76].mxu1 %vm365_vm0, %v5644_v61  ;;  %v229_v61 = vld [vmem:[%s6444_s1 + $0xe0] sm:$0xff] }
 0x6c8   : > { %2014 = vmatprep.mubr.f32.mxu0 %v4568_v28  ;;  %2175 = vmatprep.mubr.f32.mxu1 %v4568_v28 }
 0x6cb   : > { %3405 = vmatmul.mubr.msk.f32.gmra.mrb[78].mxu0 %vm365_vm0, %v5642_v5  ;;  %3421 = vmatmul.mubr.msk.f32.gmra.mrb[78].mxu1 %vm365_vm0, %v5642_v5  ;;  %v4073_v5 = vpack.c.bf16 %v232_v17, %v224_v8 }
 0x6cc   : > { %2020 = vmatprep.mubr.f32.mxu0 %v4568_v28  ;;  %2181 = vmatprep.mubr.f32.mxu1 %v4568_v28 }
 0x6cf   : > { %3406 = vmatmul.mubr.msk.f32.gmra.mrb[80].mxu0 %vm365_vm0, %v5654_v13  ;;  %3422 = vmatmul.mubr.msk.f32.gmra.mrb[80].mxu1 %vm365_vm0, %v5654_v13  ;;  %v231_v13 = vld [vmem:[%s6444_s1 + $0xf0] sm:$0xff] }
 0x6d0   : > { %2026 = vmatprep.mubr.f32.mxu0 %v4568_v28  ;;  %2187 = vmatprep.mubr.f32.mxu1 %v4568_v28 }
 0x6d3   : > { %3407 = vmatmul.mubr.msk.f32.gmra.mrb[82].mxu0 %vm365_vm0, %v5652_v12  ;;  %3423 = vmatmul.mubr.msk.f32.gmra.mrb[82].mxu1 %vm365_vm0, %v5652_v12  ;;  %v223_v12 = vld [vmem:[%s6444_s1 + $0xb0] sm:$0xff] }
 0x6d4   : > { %2032 = vmatprep.mubr.f32.mxu0 %v4568_v28  ;;  %2193 = vmatprep.mubr.f32.mxu1 %v4568_v28 }
 0x6d7   : > { %3408 = vmatmul.mubr.msk.f32.gmra.mrb[84].mxu0 %vm365_vm0, %v5664_v47  ;;  %3424 = vmatmul.mubr.msk.f32.gmra.mrb[84].mxu1 %vm365_vm0, %v5664_v47  ;;  %v4075_v47 = vpack.c.bf16 %v231_v13, %v223_v12 }
 0x6d8   : > { %2038 = vmatprep.mubr.f32.mxu0 %v4568_v28  ;;  %2199 = vmatprep.mubr.f32.mxu1 %v4568_v28 }
 0x6db   : > { %3409 = vmatmul.mubr.msk.f32.gmra.mrb[86].mxu0 %vm365_vm0, %v5662_v31  ;;  %3425 = vmatmul.mubr.msk.f32.gmra.mrb[86].mxu1 %vm365_vm0, %v5662_v31  ;;  %v4067_v31 = vpack.c.bf16 %v229_v61, %v221_v22 }
 0x6dc   : > { %2044 = vmatprep.mubr.f32.mxu0 %v4568_v28  ;;  %2205 = vmatprep.mubr.f32.mxu1 %v4568_v28 }
 0x6df   : > { %3410 = vmatmul.mubr.msk.f32.gmra.mrb[88].mxu0 %vm365_vm0, %v5674_v59  ;;  %3426 = vmatmul.mubr.msk.f32.gmra.mrb[88].mxu1 %vm365_vm0, %v5674_v59 }
 0x6e0   : > { %2050 = vmatprep.mubr.f32.mxu0 %v4568_v28  ;;  %2211 = vmatprep.mubr.f32.mxu1 %v4568_v28 }
 0x6e3   : > { %3411 = vmatmul.mubr.msk.f32.gmra.mrb[90].mxu0 %vm365_vm0, %v5672_v34  ;;  %3427 = vmatmul.mubr.msk.f32.gmra.mrb[90].mxu1 %vm365_vm0, %v5672_v34 }
 0x6e4   : > { %2056 = vmatprep.mubr.f32.mxu0 %v4568_v28  ;;  %2217 = vmatprep.mubr.f32.mxu1 %v4568_v28 }
 0x6e7   : > { %3412 = vmatmul.mubr.msk.f32.gmra.mrb[92].mxu0 %vm365_vm0, %v5684_v39  ;;  %3428 = vmatmul.mubr.msk.f32.gmra.mrb[92].mxu1 %vm365_vm0, %v5684_v39 }
 0x6e8   : > { %2062 = vmatprep.mubr.f32.mxu0 %v4568_v28  ;;  %2223 = vmatprep.mubr.f32.mxu1 %v4568_v28 }
 0x6eb   : > { %3413 = vmatmul.mubr.msk.f32.gmra.mrb[94].mxu0 %vm365_vm0, %v5682_v42  ;;  %3429 = vmatmul.mubr.msk.f32.gmra.mrb[94].mxu1 %vm365_vm0, %v5682_v42 }
 0x6ec   : > { %2342 = vmatprep.mubr.f32.mxu0 %v4568_v28  ;;  %2503 = vmatprep.mubr.f32.mxu1 %v4568_v28 }
 0x6ef   : > { %3430 = vmatmul.mubr.msk.f32.vlgmr.msra.gmra.mrb[32].mxu0 %vm365_vm0, %v5290_v24  ;;  %3446 = vmatmul.mubr.msk.f32.vlgmr.msra.gmra.mrb[32].mxu1 %vm365_vm0, %v5290_v24 }
 0x6f0   : > { %4064 = vmatpush1.bf16.msra.mxu0 %v4063_v55  ;;  %4072 = vmatpush1.bf16.msra.mxu1 %v4071_v0 }
 0x6f1   : > { %2348 = vmatprep.mubr.f32.mxu0 %v4568_v28  ;;  %2509 = vmatprep.mubr.f32.mxu1 %v4568_v28 }
 0x6f2   : > { %4066 = vmatprep.subr.bf16.mxu0 %v4065_v10  ;;  %4074 = vmatprep.subr.bf16.mxu1 %v4073_v5 }
 0x6f3   : > { %3431 = vmatmul.mubr.msk.f32.gmra.mrb[34].mxu0 %vm365_vm0, %v5288_v35  ;;  %3447 = vmatmul.mubr.msk.f32.gmra.mrb[34].mxu1 %vm365_vm0, %v5288_v35 }
 0x6f4   : > { %2354 = vmatprep.mubr.f32.mxu0 %v4568_v28  ;;  %2515 = vmatprep.mubr.f32.mxu1 %v4568_v28 }
 0x6f5   : > { %4068 = vmatpush1.bf16.msra.mxu0 %v4067_v31  ;;  %4076 = vmatpush1.bf16.msra.mxu1 %v4075_v47 }
 0x6f7   : > { %3432 = vmatmul.mubr.msk.f32.gmra.mrb[36].mxu0 %vm365_vm0, %v5294_v1  ;;  %3448 = vmatmul.mubr.msk.f32.gmra.mrb[36].mxu1 %vm365_vm0, %v5294_v1 }
 0x6f8   : > { %2360 = vmatprep.mubr.f32.mxu0 %v4568_v28  ;;  %2521 = vmatprep.mubr.f32.mxu1 %v4568_v28 }
 0x6fb   : > { %3433 = vmatmul.mubr.msk.f32.gmra.mrb[38].mxu0 %vm365_vm0, %v5292_v63  ;;  %3449 = vmatmul.mubr.msk.f32.gmra.mrb[38].mxu1 %vm365_vm0, %v5292_v63 }
 0x6fc   : > { %2366 = vmatprep.mubr.f32.mxu0 %v4568_v28  ;;  %2527 = vmatprep.mubr.f32.mxu1 %v4568_v28 }
 0x6ff   : > { %3434 = vmatmul.mubr.msk.f32.gmra.mrb[40].mxu0 %vm365_vm0, %v5298_v19  ;;  %3450 = vmatmul.mubr.msk.f32.gmra.mrb[40].mxu1 %vm365_vm0, %v5298_v19 }
 0x700   : > { %2372 = vmatprep.mubr.f32.mxu0 %v4568_v28  ;;  %2533 = vmatprep.mubr.f32.mxu1 %v4568_v28 }
 0x703   : > { %3435 = vmatmul.mubr.msk.f32.gmra.mrb[42].mxu0 %vm365_vm0, %v5296_v18  ;;  %3451 = vmatmul.mubr.msk.f32.gmra.mrb[42].mxu1 %vm365_vm0, %v5296_v18 }
 0x704   : > { %2378 = vmatprep.mubr.f32.mxu0 %v4568_v28  ;;  %2539 = vmatprep.mubr.f32.mxu1 %v4568_v28 }
 0x707   : > { %3436 = vmatmul.mubr.msk.f32.gmra.mrb[44].mxu0 %vm365_vm0, %v5302_v3  ;;  %3452 = vmatmul.mubr.msk.f32.gmra.mrb[44].mxu1 %vm365_vm0, %v5302_v3 }
 0x708   : > { %2384 = vmatprep.mubr.f32.mxu0 %v4568_v28  ;;  %2545 = vmatprep.mubr.f32.mxu1 %v4568_v28 }
 0x70b   : > { %3437 = vmatmul.mubr.msk.f32.gmra.mrb[46].mxu0 %vm365_vm0, %v5300_v21  ;;  %3453 = vmatmul.mubr.msk.f32.gmra.mrb[46].mxu1 %vm365_vm0, %v5300_v21 }
 0x70c   : > { %2390 = vmatprep.mubr.f32.mxu0 %v4568_v28  ;;  %2551 = vmatprep.mubr.f32.mxu1 %v4568_v28 }
 0x70f   : > { %3438 = vmatmul.mubr.msk.f32.gmra.mrb[48].mxu0 %vm365_vm0, %v5306_v45  ;;  %3454 = vmatmul.mubr.msk.f32.gmra.mrb[48].mxu1 %vm365_vm0, %v5306_v45 }
 0x710   : > { %2396 = vmatprep.mubr.f32.mxu0 %v4568_v28  ;;  %2557 = vmatprep.mubr.f32.mxu1 %v4568_v28 }
 0x713   : > { %3439 = vmatmul.mubr.msk.f32.gmra.mrb[50].mxu0 %vm365_vm0, %v5304_v37  ;;  %3455 = vmatmul.mubr.msk.f32.gmra.mrb[50].mxu1 %vm365_vm0, %v5304_v37 }
 0x714   : > { %2402 = vmatprep.mubr.f32.mxu0 %v4568_v28  ;;  %2563 = vmatprep.mubr.f32.mxu1 %v4568_v28 }
 0x717   : > { %3440 = vmatmul.mubr.msk.f32.gmra.mrb[52].mxu0 %vm365_vm0, %v5310_v46  ;;  %3456 = vmatmul.mubr.msk.f32.gmra.mrb[52].mxu1 %vm365_vm0, %v5310_v46 }
 0x718   : > { %2408 = vmatprep.mubr.f32.mxu0 %v4568_v28  ;;  %2569 = vmatprep.mubr.f32.mxu1 %v4568_v28 }
 0x71b   : > { %3441 = vmatmul.mubr.msk.f32.gmra.mrb[54].mxu0 %vm365_vm0, %v5308_v2  ;;  %3457 = vmatmul.mubr.msk.f32.gmra.mrb[54].mxu1 %vm365_vm0, %v5308_v2 }
 0x71c   : > { %2414 = vmatprep.mubr.f32.mxu0 %v4568_v28  ;;  %2575 = vmatprep.mubr.f32.mxu1 %v4568_v28 }
 0x71f   : > { %3442 = vmatmul.mubr.msk.f32.gmra.mrb[56].mxu0 %vm365_vm0, %v5314_v40  ;;  %3458 = vmatmul.mubr.msk.f32.gmra.mrb[56].mxu1 %vm365_vm0, %v5314_v40 }
 0x720   : > { %2420 = vmatprep.mubr.f32.mxu0 %v4568_v28  ;;  %2581 = vmatprep.mubr.f32.mxu1 %v4568_v28 }
 0x723   : > { %3443 = vmatmul.mubr.msk.f32.gmra.mrb[58].mxu0 %vm365_vm0, %v5312_v11  ;;  %3459 = vmatmul.mubr.msk.f32.gmra.mrb[58].mxu1 %vm365_vm0, %v5312_v11 }
 0x724   : > { %2426 = vmatprep.mubr.f32.mxu0 %v4568_v28  ;;  %2587 = vmatprep.mubr.f32.mxu1 %v4568_v28 }
 0x727   : > { %3444 = vmatmul.mubr.msk.f32.gmra.mrb[60].mxu0 %vm365_vm0, %v5318_v4  ;;  %3460 = vmatmul.mubr.msk.f32.gmra.mrb[60].mxu1 %vm365_vm0, %v5318_v4 }
 0x728   : > { %2432 = vmatprep.mubr.f32.mxu0 %v4568_v28  ;;  %2593 = vmatprep.mubr.f32.mxu1 %v4568_v28 }
 0x72b   : > { %3445 = vmatmul.mubr.msk.f32.gmra.mrb[62].mxu0 %vm365_vm0, %v5316_v38  ;;  %3461 = vmatmul.mubr.msk.f32.gmra.mrb[62].mxu1 %vm365_vm0, %v5316_v38 }
 0x72c   : > { %2664 = vmatprep.mubr.f32.mxu0 %v4568_v28  ;;  %2825 = vmatprep.mubr.f32.mxu1 %v4568_v28 }
 0x72f   : > { %3462 = vmatmul.mubr.msk.f32.vlgmr.msra.gmra.mrb[64].mxu0 %vm365_vm0, %v5290_v24  ;;  %3478 = vmatmul.mubr.msk.f32.vlgmr.msra.gmra.mrb[64].mxu1 %vm365_vm0, %v5290_v24  ;;  %v2933_v24 = vsub.s32 2, %v4913_v48 }
 0x730   : > { %2670 = vmatprep.mubr.f32.mxu0 %v4568_v28  ;;  %2831 = vmatprep.mubr.f32.mxu1 %v4568_v28 }
 0x733   : > { %3463 = vmatmul.mubr.msk.f32.gmra.mrb[66].mxu0 %vm365_vm0, %v5288_v35  ;;  %3479 = vmatmul.mubr.msk.f32.gmra.mrb[66].mxu1 %vm365_vm0, %v5288_v35  ;;  %v2925_v35 = vsub.s32 0, %v4913_v48 }
 0x734   : > { %2676 = vmatprep.mubr.f32.mxu0 %v4568_v28  ;;  %2837 = vmatprep.mubr.f32.mxu1 %v4568_v28 }
 0x737   : > { %3464 = vmatmul.mubr.msk.f32.gmra.mrb[68].mxu0 %vm365_vm0, %v5294_v1  ;;  %3480 = vmatmul.mubr.msk.f32.gmra.mrb[68].mxu1 %vm365_vm0, %v5294_v1  ;;  %v2929_v1 = vsub.s32 1, %v4913_v48 }
 0x738   : > { %2682 = vmatprep.mubr.f32.mxu0 %v4568_v28  ;;  %2843 = vmatprep.mubr.f32.mxu1 %v4568_v28 }
 0x73b   : > { %3465 = vmatmul.mubr.msk.f32.gmra.mrb[70].mxu0 %vm365_vm0, %v5292_v63  ;;  %3481 = vmatmul.mubr.msk.f32.gmra.mrb[70].mxu1 %vm365_vm0, %v5292_v63  ;;  %v6098_v63 = vld [vmem:[%s6445_s2] sm:$0xff] }
 0x73c   : > { %2688 = vmatprep.mubr.f32.mxu0 %v4568_v28  ;;  %2849 = vmatprep.mubr.f32.mxu1 %v4568_v28 }
 0x73f   : > { %3466 = vmatmul.mubr.msk.f32.gmra.mrb[72].mxu0 %vm365_vm0, %v5298_v19  ;;  %3482 = vmatmul.mubr.msk.f32.gmra.mrb[72].mxu1 %vm365_vm0, %v5298_v19  ;;  %v6105_v19 = vrot.slane %v6098_v63, %v2925_v35 }
 0x740   : > { %2694 = vmatprep.mubr.f32.mxu0 %v4568_v28  ;;  %2855 = vmatprep.mubr.f32.mxu1 %v4568_v28 }
 0x743   : > { %3467 = vmatmul.mubr.msk.f32.gmra.mrb[74].mxu0 %vm365_vm0, %v5296_v18  ;;  %3483 = vmatmul.mubr.msk.f32.gmra.mrb[74].mxu1 %vm365_vm0, %v5296_v18  ;;  %v2937_v18 = vsub.s32 3, %v4913_v48 }
 0x744   : > { %2700 = vmatprep.mubr.f32.mxu0 %v4568_v28  ;;  %2861 = vmatprep.mubr.f32.mxu1 %v4568_v28 }
 0x747   : > { %3468 = vmatmul.mubr.msk.f32.gmra.mrb[76].mxu0 %vm365_vm0, %v5302_v3  ;;  %3484 = vmatmul.mubr.msk.f32.gmra.mrb[76].mxu1 %vm365_vm0, %v5302_v3  ;;  %v6111_v3 = vrot.slane %v6098_v63, %v2929_v1 }
 0x748   : > { %2706 = vmatprep.mubr.f32.mxu0 %v4568_v28  ;;  %2867 = vmatprep.mubr.f32.mxu1 %v4568_v28 }
 0x74b   : > { %3469 = vmatmul.mubr.msk.f32.gmra.mrb[78].mxu0 %vm365_vm0, %v5300_v21  ;;  %3485 = vmatmul.mubr.msk.f32.gmra.mrb[78].mxu1 %vm365_vm0, %v5300_v21  ;;  %v6108_v21 = vrot.slane %v6098_v63, %v2933_v24 }
 0x74c   : > { %2712 = vmatprep.mubr.f32.mxu0 %v4568_v28  ;;  %2873 = vmatprep.mubr.f32.mxu1 %v4568_v28 }
 0x74f   : > { %3470 = vmatmul.mubr.msk.f32.gmra.mrb[80].mxu0 %vm365_vm0, %v5306_v45  ;;  %3486 = vmatmul.mubr.msk.f32.gmra.mrb[80].mxu1 %vm365_vm0, %v5306_v45 }
 0x750   : > { %2718 = vmatprep.mubr.f32.mxu0 %v4568_v28  ;;  %2879 = vmatprep.mubr.f32.mxu1 %v4568_v28 }
 0x753   : > { %3471 = vmatmul.mubr.msk.f32.gmra.mrb[82].mxu0 %vm365_vm0, %v5304_v37  ;;  %3487 = vmatmul.mubr.msk.f32.gmra.mrb[82].mxu1 %vm365_vm0, %v5304_v37  ;;  %v6114_v37 = vrot.slane %v6098_v63, %v2937_v18 }
 0x754   : > { %2724 = vmatprep.mubr.f32.mxu0 %v4568_v28  ;;  %2885 = vmatprep.mubr.f32.mxu1 %v4568_v28 }
 0x757   : > { %3472 = vmatmul.mubr.msk.f32.gmra.mrb[84].mxu0 %vm365_vm0, %v5310_v46  ;;  %3488 = vmatmul.mubr.msk.f32.gmra.mrb[84].mxu1 %vm365_vm0, %v5310_v46 }
 0x758   : > { %2730 = vmatprep.mubr.f32.mxu0 %v4568_v28  ;;  %2891 = vmatprep.mubr.f32.mxu1 %v4568_v28 }
 0x75b   : > { %3473 = vmatmul.mubr.msk.f32.gmra.mrb[86].mxu0 %vm365_vm0, %v5308_v2  ;;  %3489 = vmatmul.mubr.msk.f32.gmra.mrb[86].mxu1 %vm365_vm0, %v5308_v2 }
 0x75c   : > { %2736 = vmatprep.mubr.f32.mxu0 %v4568_v28  ;;  %2897 = vmatprep.mubr.f32.mxu1 %v4568_v28 }
 0x75f   : > { %3474 = vmatmul.mubr.msk.f32.gmra.mrb[88].mxu0 %vm365_vm0, %v5314_v40  ;;  %3490 = vmatmul.mubr.msk.f32.gmra.mrb[88].mxu1 %vm365_vm0, %v5314_v40 }
 0x760   : > { %2742 = vmatprep.mubr.f32.mxu0 %v4568_v28  ;;  %2903 = vmatprep.mubr.f32.mxu1 %v4568_v28 }
 0x763   : > { %3475 = vmatmul.mubr.msk.f32.gmra.mrb[90].mxu0 %vm365_vm0, %v5312_v11  ;;  %3491 = vmatmul.mubr.msk.f32.gmra.mrb[90].mxu1 %vm365_vm0, %v5312_v11 }
 0x764   : > { %2748 = vmatprep.mubr.f32.mxu0 %v4568_v28  ;;  %2909 = vmatprep.mubr.f32.mxu1 %v4568_v28 }
 0x767   : > { %3476 = vmatmul.mubr.msk.f32.gmra.mrb[92].mxu0 %vm365_vm0, %v5318_v4  ;;  %3492 = vmatmul.mubr.msk.f32.gmra.mrb[92].mxu1 %vm365_vm0, %v5318_v4 }
 0x768   : > { %2754 = vmatprep.mubr.f32.mxu0 %v4568_v28  ;;  %2915 = vmatprep.mubr.f32.mxu1 %v4568_v28 }
 0x76b   : > { %3477 = vmatmul.mubr.msk.f32.gmra.mrb[94].mxu0 %vm365_vm0, %v5316_v38  ;;  %3493 = vmatmul.mubr.msk.f32.gmra.mrb[94].mxu1 %vm365_vm0, %v5316_v38 }
 0x7c2   : > { %v2344_v45 = vpop.f32.mrb[32].mxu0  ;;  %v2505_v2 = vpop.f32.mrb[32].mxu1 }
 0x7c3   : > { %v2963_v46 = vadd.f32 %v6105_v19, %v2344_v45  ;;  %v2965_v11 = vadd.f32 %v6108_v21, %v2505_v2  ;;  %v2346_v40 = vpop.f32.mrb[33].mxu0  ;;  %v2507_v38 = vpop.f32.mrb[33].mxu1 }
 0x7c4   : > { %v2964_v4 = vadd.f32 %v6111_v3, %v2346_v40  ;;  %v2966_v28 = vadd.f32 %v6114_v37, %v2507_v38 }
 0x7c5   : > { %3091 = vst [vmem:[%s6120_s27] sm:$0xff] %v2963_v46  ;;  %3093 = vst [vmem:[%s6120_s27 + $0x10] sm:$0xff] %v2965_v11 }
 0x7c6   : > { %3092 = vst [vmem:[%s6120_s27 + $0x8] sm:$0xff] %v2964_v4  ;;  %3094 = vst [vmem:[%s6120_s27 + $0x18] sm:$0xff] %v2966_v28  ;;  %v2350_v34 = vpop.f32.mrb[34].mxu0  ;;  %v2511_v59 = vpop.f32.mrb[34].mxu1 }
 0x7c7   : > { %v2971_v42 = vadd.f32 %v6105_v19, %v2350_v34  ;;  %v2973_v39 = vadd.f32 %v6108_v21, %v2511_v59  ;;  %v2352_v60 = vpop.f32.mrb[35].mxu0  ;;  %v2513_v32 = vpop.f32.mrb[35].mxu1 }
 0x7c8   : > { %v2972_v62 = vadd.f32 %v6111_v3, %v2352_v60  ;;  %v2974_v6 = vadd.f32 %v6114_v37, %v2513_v32 }
 0x7c9   : > { %3099 = vst [vmem:[%s6120_s27 + $0x40] sm:$0xff] %v2971_v42  ;;  %3101 = vst [vmem:[%s6120_s27 + $0x50] sm:$0xff] %v2973_v39 }
 0x7ca   : > { %3100 = vst [vmem:[%s6120_s27 + $0x48] sm:$0xff] %v2972_v62  ;;  %3102 = vst [vmem:[%s6120_s27 + $0x58] sm:$0xff] %v2974_v6  ;;  %v2356_v30 = vpop.f32.mrb[36].mxu0  ;;  %v2517_v7 = vpop.f32.mrb[36].mxu1 }
 0x7cb   : > { %v2979_v57 = vadd.f32 %v6105_v19, %v2356_v30  ;;  %v2981_v52 = vadd.f32 %v6108_v21, %v2517_v7  ;;  %v2358_v54 = vpop.f32.mrb[37].mxu0  ;;  %v2519_v51 = vpop.f32.mrb[37].mxu1 }
 0x7cc   : > { %v2980_v50 = vadd.f32 %v6111_v3, %v2358_v54  ;;  %v2982_v26 = vadd.f32 %v6114_v37, %v2519_v51 }
 0x7cd   : > { %3107 = vst [vmem:[%s6120_s27 + $0x80] sm:$0xff] %v2979_v57  ;;  %3109 = vst [vmem:[%s6120_s27 + $0x90] sm:$0xff] %v2981_v52 }
 0x7ce   : > { %3108 = vst [vmem:[%s6120_s27 + $0x88] sm:$0xff] %v2980_v50  ;;  %3110 = vst [vmem:[%s6120_s27 + $0x98] sm:$0xff] %v2982_v26  ;;  %v2362_v27 = vpop.f32.mrb[38].mxu0  ;;  %v2523_v33 = vpop.f32.mrb[38].mxu1 }
 0x7cf   : > { %v2987_v53 = vadd.f32 %v6105_v19, %v2362_v27  ;;  %v2989_v29 = vadd.f32 %v6108_v21, %v2523_v33  ;;  %v2364_v43 = vpop.f32.mrb[39].mxu0  ;;  %v2525_v14 = vpop.f32.mrb[39].mxu1 }
 0x7d0   : > { %v2988_v36 = vadd.f32 %v6111_v3, %v2364_v43  ;;  %v2990_v49 = vadd.f32 %v6114_v37, %v2525_v14 }
 0x7d1   : > { %3115 = vst [vmem:[%s6120_s27 + $0xc0] sm:$0xff] %v2987_v53  ;;  %3117 = vst [vmem:[%s6120_s27 + $0xd0] sm:$0xff] %v2989_v29 }
 0x7d2   : > { %3116 = vst [vmem:[%s6120_s27 + $0xc8] sm:$0xff] %v2988_v36  ;;  %3118 = vst [vmem:[%s6120_s27 + $0xd8] sm:$0xff] %v2990_v49  ;;  %v2368_v25 = vpop.f32.mrb[40].mxu0  ;;  %v2529_v20 = vpop.f32.mrb[40].mxu1 }
 0x7d3   : > { %v2995_v44 = vadd.f32 %v6105_v19, %v2368_v25  ;;  %v2997_v23 = vadd.f32 %v6108_v21, %v2529_v20  ;;  %v2370_v56 = vpop.f32.mrb[41].mxu0  ;;  %v2531_v9 = vpop.f32.mrb[41].mxu1 }
 0x7d4   : > { %v2996_v58 = vadd.f32 %v6111_v3, %v2370_v56  ;;  %v2998_v15 = vadd.f32 %v6114_v37, %v2531_v9 }
 0x7d5   : > { %3123 = vst [vmem:[%s6120_s27 + $0x100] sm:$0xff] %v2995_v44  ;;  %3125 = vst [vmem:[%s6120_s27 + $0x110] sm:$0xff] %v2997_v23 }
 0x7d6   : > { %3124 = vst [vmem:[%s6120_s27 + $0x108] sm:$0xff] %v2996_v58  ;;  %3126 = vst [vmem:[%s6120_s27 + $0x118] sm:$0xff] %v2998_v15  ;;  %v2374_v16 = vpop.f32.mrb[42].mxu0  ;;  %v2535_v41 = vpop.f32.mrb[42].mxu1 }
 0x7d7   : > { %v3003_v8 = vadd.f32 %v6105_v19, %v2374_v16  ;;  %v3005_v17 = vadd.f32 %v6108_v21, %v2535_v41  ;;  %v2376_v55 = vpop.f32.mrb[43].mxu0  ;;  %v2537_v0 = vpop.f32.mrb[43].mxu1 }
 0x7d8   : > { %v3004_v22 = vadd.f32 %v6111_v3, %v2376_v55  ;;  %v3006_v10 = vadd.f32 %v6114_v37, %v2537_v0 }
 0x7d9   : > { %3131 = vst [vmem:[%s6120_s27 + $0x140] sm:$0xff] %v3003_v8  ;;  %3133 = vst [vmem:[%s6120_s27 + $0x150] sm:$0xff] %v3005_v17 }
 0x7da   : > { %3132 = vst [vmem:[%s6120_s27 + $0x148] sm:$0xff] %v3004_v22  ;;  %3134 = vst [vmem:[%s6120_s27 + $0x158] sm:$0xff] %v3006_v10  ;;  %v2380_v5 = vpop.f32.mrb[44].mxu0  ;;  %v2541_v61 = vpop.f32.mrb[44].mxu1 }
 0x7db   : > { %v3011_v12 = vadd.f32 %v6105_v19, %v2380_v5  ;;  %v3013_v13 = vadd.f32 %v6108_v21, %v2541_v61  ;;  %v2382_v31 = vpop.f32.mrb[45].mxu0  ;;  %v2543_v47 = vpop.f32.mrb[45].mxu1 }
 0x7dc   : > { %v3012_v35 = vadd.f32 %v6111_v3, %v2382_v31  ;;  %v3014_v24 = vadd.f32 %v6114_v37, %v2543_v47 }
 0x7dd   : > { %3139 = vst [vmem:[%s6120_s27 + $0x180] sm:$0xff] %v3011_v12  ;;  %3141 = vst [vmem:[%s6120_s27 + $0x190] sm:$0xff] %v3013_v13 }
 0x7de   : > { %3140 = vst [vmem:[%s6120_s27 + $0x188] sm:$0xff] %v3012_v35  ;;  %3142 = vst [vmem:[%s6120_s27 + $0x198] sm:$0xff] %v3014_v24  ;;  %v2386_v1 = vpop.f32.mrb[46].mxu0  ;;  %v2547_v18 = vpop.f32.mrb[46].mxu1 }
 0x7df   : > { %v3019_v45 = vadd.f32 %v6105_v19, %v2386_v1  ;;  %v3021_v2 = vadd.f32 %v6108_v21, %v2547_v18  ;;  %v2388_v46 = vpop.f32.mrb[47].mxu0  ;;  %v2549_v11 = vpop.f32.mrb[47].mxu1 }
 0x7e0   : > { %v3020_v40 = vadd.f32 %v6111_v3, %v2388_v46  ;;  %v3022_v38 = vadd.f32 %v6114_v37, %v2549_v11  ;;  %v2941_v46 = vsub.s32 4, %v4913_v48  ;;  %v2949_v11 = vsub.s32 6, %v4913_v48 }
 0x7e1   : > { %3147 = vst [vmem:[%s6120_s27 + $0x1c0] sm:$0xff] %v3019_v45  ;;  %3149 = vst [vmem:[%s6120_s27 + $0x1d0] sm:$0xff] %v3021_v2 }
 0x7e2   : > { %3148 = vst [vmem:[%s6120_s27 + $0x1c8] sm:$0xff] %v3020_v40  ;;  %3150 = vst [vmem:[%s6120_s27 + $0x1d8] sm:$0xff] %v3022_v38  ;;  %v2392_v4 = vpop.f32.mrb[48].mxu0  ;;  %v2553_v28 = vpop.f32.mrb[48].mxu1 }
 0x7e3   : > { %v3027_v34 = vadd.f32 %v6105_v19, %v2392_v4  ;;  %v3029_v59 = vadd.f32 %v6108_v21, %v2553_v28  ;;  %v2394_v42 = vpop.f32.mrb[49].mxu0  ;;  %v2555_v39 = vpop.f32.mrb[49].mxu1  ;;  %v2945_v4 = vsub.s32 5, %v4913_v48  ;;  %v2953_v28 = vsub.s32 7, %v4913_v48 }
 0x7e4   : > { %v3028_v60 = vadd.f32 %v6111_v3, %v2394_v42  ;;  %v3030_v32 = vadd.f32 %v6114_v37, %v2555_v39  ;;  %v6248_v48 = vrot.slane %v6098_v63, %v2949_v11 }
 0x7e5   : > { %3155 = vst [vmem:[%s6120_s27 + $0x200] sm:$0xff] %v3027_v34  ;;  %3157 = vst [vmem:[%s6120_s27 + $0x210] sm:$0xff] %v3029_v59 }
 0x7e6   : > { %3156 = vst [vmem:[%s6120_s27 + $0x208] sm:$0xff] %v3028_v60  ;;  %3158 = vst [vmem:[%s6120_s27 + $0x218] sm:$0xff] %v3030_v32  ;;  %v2398_v62 = vpop.f32.mrb[50].mxu0  ;;  %v2559_v6 = vpop.f32.mrb[50].mxu1 }
 0x7e7   : > { %v3035_v30 = vadd.f32 %v6105_v19, %v2398_v62  ;;  %v3037_v7 = vadd.f32 %v6108_v21, %v2559_v6  ;;  %v2400_v57 = vpop.f32.mrb[51].mxu0  ;;  %v2561_v52 = vpop.f32.mrb[51].mxu1  ;;  %v6245_v62 = vrot.slane %v6098_v63, %v2941_v46 }
 0x7e8   : > { %v3036_v54 = vadd.f32 %v6111_v3, %v2400_v57  ;;  %v3038_v51 = vadd.f32 %v6114_v37, %v2561_v52 }
 0x7e9   : > { %3163 = vst [vmem:[%s6120_s27 + $0x240] sm:$0xff] %v3035_v30  ;;  %3165 = vst [vmem:[%s6120_s27 + $0x250] sm:$0xff] %v3037_v7  ;;  %v6253_v7 = vrot.slane %v6098_v63, %v2945_v4 }
 0x7ea   : > { %3164 = vst [vmem:[%s6120_s27 + $0x248] sm:$0xff] %v3036_v54  ;;  %3166 = vst [vmem:[%s6120_s27 + $0x258] sm:$0xff] %v3038_v51  ;;  %v2404_v50 = vpop.f32.mrb[52].mxu0  ;;  %v2565_v26 = vpop.f32.mrb[52].mxu1 }
 0x7eb   : > { %v3043_v27 = vadd.f32 %v6105_v19, %v2404_v50  ;;  %v3045_v33 = vadd.f32 %v6108_v21, %v2565_v26  ;;  %v2406_v53 = vpop.f32.mrb[53].mxu0  ;;  %v2567_v29 = vpop.f32.mrb[53].mxu1 }
 0x7ec   : > { %v3044_v43 = vadd.f32 %v6111_v3, %v2406_v53  ;;  %v3046_v14 = vadd.f32 %v6114_v37, %v2567_v29 }
 0x7ed   : > { %3171 = vst [vmem:[%s6120_s27 + $0x280] sm:$0xff] %v3043_v27  ;;  %3173 = vst [vmem:[%s6120_s27 + $0x290] sm:$0xff] %v3045_v33 }
 0x7ee   : > { %3172 = vst [vmem:[%s6120_s27 + $0x288] sm:$0xff] %v3044_v43  ;;  %3174 = vst [vmem:[%s6120_s27 + $0x298] sm:$0xff] %v3046_v14  ;;  %v2410_v36 = vpop.f32.mrb[54].mxu0  ;;  %v2571_v49 = vpop.f32.mrb[54].mxu1 }
 0x7ef   : > { %v3051_v25 = vadd.f32 %v6105_v19, %v2410_v36  ;;  %v3053_v20 = vadd.f32 %v6108_v21, %v2571_v49  ;;  %v2412_v44 = vpop.f32.mrb[55].mxu0  ;;  %v2573_v23 = vpop.f32.mrb[55].mxu1 }
 0x7f0   : > { %v3052_v56 = vadd.f32 %v6111_v3, %v2412_v44  ;;  %v3054_v9 = vadd.f32 %v6114_v37, %v2573_v23 }
 0x7f1   : > { %3179 = vst [vmem:[%s6120_s27 + $0x2c0] sm:$0xff] %v3051_v25  ;;  %3181 = vst [vmem:[%s6120_s27 + $0x2d0] sm:$0xff] %v3053_v20 }
 0x7f2   : > { %3180 = vst [vmem:[%s6120_s27 + $0x2c8] sm:$0xff] %v3052_v56  ;;  %3182 = vst [vmem:[%s6120_s27 + $0x2d8] sm:$0xff] %v3054_v9  ;;  %v2416_v58 = vpop.f32.mrb[56].mxu0  ;;  %v2577_v15 = vpop.f32.mrb[56].mxu1 }
 0x7f3   : > { %v3059_v16 = vadd.f32 %v6105_v19, %v2416_v58  ;;  %v3061_v41 = vadd.f32 %v6108_v21, %v2577_v15  ;;  %v2418_v8 = vpop.f32.mrb[57].mxu0  ;;  %v2579_v17 = vpop.f32.mrb[57].mxu1 }
 0x7f4   : > { %v3060_v55 = vadd.f32 %v6111_v3, %v2418_v8  ;;  %v3062_v0 = vadd.f32 %v6114_v37, %v2579_v17 }
 0x7f5   : > { %3187 = vst [vmem:[%s6120_s27 + $0x300] sm:$0xff] %v3059_v16  ;;  %3189 = vst [vmem:[%s6120_s27 + $0x310] sm:$0xff] %v3061_v41 }
 0x7f6   : > { %3188 = vst [vmem:[%s6120_s27 + $0x308] sm:$0xff] %v3060_v55  ;;  %3190 = vst [vmem:[%s6120_s27 + $0x318] sm:$0xff] %v3062_v0  ;;  %v2422_v22 = vpop.f32.mrb[58].mxu0  ;;  %v2583_v10 = vpop.f32.mrb[58].mxu1 }
 0x7f7   : > { %v3067_v5 = vadd.f32 %v6105_v19, %v2422_v22  ;;  %v3069_v61 = vadd.f32 %v6108_v21, %v2583_v10  ;;  %v2424_v12 = vpop.f32.mrb[59].mxu0  ;;  %v2585_v13 = vpop.f32.mrb[59].mxu1 }
 0x7f8   : > { %v3068_v31 = vadd.f32 %v6111_v3, %v2424_v12  ;;  %v3070_v47 = vadd.f32 %v6114_v37, %v2585_v13 }
 0x7f9   : > { %3195 = vst [vmem:[%s6120_s27 + $0x340] sm:$0xff] %v3067_v5  ;;  %3197 = vst [vmem:[%s6120_s27 + $0x350] sm:$0xff] %v3069_v61 }
 0x7fa   : > { %3196 = vst [vmem:[%s6120_s27 + $0x348] sm:$0xff] %v3068_v31  ;;  %3198 = vst [vmem:[%s6120_s27 + $0x358] sm:$0xff] %v3070_v47  ;;  %v2428_v35 = vpop.f32.mrb[60].mxu0  ;;  %v2589_v24 = vpop.f32.mrb[60].mxu1 }
 0x7fb   : > { %v3075_v1 = vadd.f32 %v6105_v19, %v2428_v35  ;;  %v3077_v18 = vadd.f32 %v6108_v21, %v2589_v24  ;;  %v2430_v45 = vpop.f32.mrb[61].mxu0  ;;  %v2591_v2 = vpop.f32.mrb[61].mxu1 }
 0x7fc   : > { %v3076_v40 = vadd.f32 %v6111_v3, %v2430_v45  ;;  %v3078_v38 = vadd.f32 %v6114_v37, %v2591_v2 }
 0x7fd   : > { %3203 = vst [vmem:[%s6120_s27 + $0x380] sm:$0xff] %v3075_v1  ;;  %3205 = vst [vmem:[%s6120_s27 + $0x390] sm:$0xff] %v3077_v18 }
 0x7fe   : > { %3204 = vst [vmem:[%s6120_s27 + $0x388] sm:$0xff] %v3076_v40  ;;  %3206 = vst [vmem:[%s6120_s27 + $0x398] sm:$0xff] %v3078_v38  ;;  %v2434_v34 = vpop.f32.mrb[62].mxu0  ;;  %v2595_v59 = vpop.f32.mrb[62].mxu1 }
 0x7ff   : > { %v3083_v42 = vadd.f32 %v6105_v19, %v2434_v34  ;;  %v3085_v39 = vadd.f32 %v6108_v21, %v2595_v59  ;;  %v2436_v60 = vpop.f32.mrb[63].mxu0  ;;  %v2597_v32 = vpop.f32.mrb[63].mxu1  ;;  %v6256_v19 = vrot.slane %v6098_v63, %v2953_v28 }
 0x800   : > { %v3084_v6 = vadd.f32 %v6111_v3, %v2436_v60  ;;  %v3086_v30 = vadd.f32 %v6114_v37, %v2597_v32 }
 0x801   : > { %3211 = vst [vmem:[%s6120_s27 + $0x3c0] sm:$0xff] %v3083_v42  ;;  %3213 = vst [vmem:[%s6120_s27 + $0x3d0] sm:$0xff] %v3085_v39 }
 0x802   : > { %3212 = vst [vmem:[%s6120_s27 + $0x3c8] sm:$0xff] %v3084_v6  ;;  %3214 = vst [vmem:[%s6120_s27 + $0x3d8] sm:$0xff] %v3086_v30  ;;  %v2666_v21 = vpop.f32.mrb[64].mxu0  ;;  %v2827_v57 = vpop.f32.mrb[64].mxu1 }
 0x803   : > { %v2967_v3 = vadd.f32 %v6245_v62, %v2666_v21  ;;  %v2969_v52 = vadd.f32 %v6248_v48, %v2827_v57  ;;  %v2668_v37 = vpop.f32.mrb[65].mxu0  ;;  %v2829_v54 = vpop.f32.mrb[65].mxu1 }
 0x804   : > { %v2968_v51 = vadd.f32 %v6253_v7, %v2668_v37  ;;  %v2970_v63 = vadd.f32 %v6256_v19, %v2829_v54 }
 0x805   : > { %3095 = vst [vmem:[%s6120_s27 + $0x20] sm:$0xff] %v2967_v3  ;;  %3097 = vst [vmem:[%s6120_s27 + $0x30] sm:$0xff] %v2969_v52 }
 0x806   : > { %3096 = vst [vmem:[%s6120_s27 + $0x28] sm:$0xff] %v2968_v51  ;;  %3098 = vst [vmem:[%s6120_s27 + $0x38] sm:$0xff] %v2970_v63  ;;  %v2672_v50 = vpop.f32.mrb[66].mxu0  ;;  %v2833_v26 = vpop.f32.mrb[66].mxu1 }
 0x807   : > { %v2975_v27 = vadd.f32 %v6245_v62, %v2672_v50  ;;  %v2977_v33 = vadd.f32 %v6248_v48, %v2833_v26  ;;  %v2674_v53 = vpop.f32.mrb[67].mxu0  ;;  %v2835_v29 = vpop.f32.mrb[67].mxu1 }
 0x808   : > { %v2976_v43 = vadd.f32 %v6253_v7, %v2674_v53  ;;  %v2978_v14 = vadd.f32 %v6256_v19, %v2835_v29 }
 0x809   : > { %3103 = vst [vmem:[%s6120_s27 + $0x60] sm:$0xff] %v2975_v27  ;;  %3105 = vst [vmem:[%s6120_s27 + $0x70] sm:$0xff] %v2977_v33 }
 0x80a   : > { %3104 = vst [vmem:[%s6120_s27 + $0x68] sm:$0xff] %v2976_v43  ;;  %3106 = vst [vmem:[%s6120_s27 + $0x78] sm:$0xff] %v2978_v14  ;;  %v2678_v36 = vpop.f32.mrb[68].mxu0  ;;  %v2839_v49 = vpop.f32.mrb[68].mxu1 }
 0x80b   : > { %v2983_v25 = vadd.f32 %v6245_v62, %v2678_v36  ;;  %v2985_v20 = vadd.f32 %v6248_v48, %v2839_v49  ;;  %v2680_v44 = vpop.f32.mrb[69].mxu0  ;;  %v2841_v23 = vpop.f32.mrb[69].mxu1 }
 0x80c   : > { %v2984_v56 = vadd.f32 %v6253_v7, %v2680_v44  ;;  %v2986_v9 = vadd.f32 %v6256_v19, %v2841_v23 }
 0x80d   : > { %3111 = vst [vmem:[%s6120_s27 + $0xa0] sm:$0xff] %v2983_v25  ;;  %3113 = vst [vmem:[%s6120_s27 + $0xb0] sm:$0xff] %v2985_v20 }
 0x80e   : > { %3112 = vst [vmem:[%s6120_s27 + $0xa8] sm:$0xff] %v2984_v56  ;;  %3114 = vst [vmem:[%s6120_s27 + $0xb8] sm:$0xff] %v2986_v9  ;;  %v2684_v58 = vpop.f32.mrb[70].mxu0  ;;  %v2845_v15 = vpop.f32.mrb[70].mxu1 }
 0x80f   : > { %v2991_v16 = vadd.f32 %v6245_v62, %v2684_v58  ;;  %v2993_v41 = vadd.f32 %v6248_v48, %v2845_v15  ;;  %v2686_v8 = vpop.f32.mrb[71].mxu0  ;;  %v2847_v17 = vpop.f32.mrb[71].mxu1 }
 0x810   : > { %v2992_v55 = vadd.f32 %v6253_v7, %v2686_v8  ;;  %v2994_v0 = vadd.f32 %v6256_v19, %v2847_v17 }
 0x811   : > { %3119 = vst [vmem:[%s6120_s27 + $0xe0] sm:$0xff] %v2991_v16  ;;  %3121 = vst [vmem:[%s6120_s27 + $0xf0] sm:$0xff] %v2993_v41 }
 0x812   : > { %3120 = vst [vmem:[%s6120_s27 + $0xe8] sm:$0xff] %v2992_v55  ;;  %3122 = vst [vmem:[%s6120_s27 + $0xf8] sm:$0xff] %v2994_v0  ;;  %v2690_v22 = vpop.f32.mrb[72].mxu0  ;;  %v2851_v10 = vpop.f32.mrb[72].mxu1 }
 0x813   : > { %v2999_v5 = vadd.f32 %v6245_v62, %v2690_v22  ;;  %v3001_v61 = vadd.f32 %v6248_v48, %v2851_v10  ;;  %v2692_v12 = vpop.f32.mrb[73].mxu0  ;;  %v2853_v13 = vpop.f32.mrb[73].mxu1 }
 0x814   : > { %v3000_v31 = vadd.f32 %v6253_v7, %v2692_v12  ;;  %v3002_v47 = vadd.f32 %v6256_v19, %v2853_v13 }
 0x815   : > { %3127 = vst [vmem:[%s6120_s27 + $0x120] sm:$0xff] %v2999_v5  ;;  %3129 = vst [vmem:[%s6120_s27 + $0x130] sm:$0xff] %v3001_v61 }
 0x816   : > { %3128 = vst [vmem:[%s6120_s27 + $0x128] sm:$0xff] %v3000_v31  ;;  %3130 = vst [vmem:[%s6120_s27 + $0x138] sm:$0xff] %v3002_v47  ;;  %v2696_v35 = vpop.f32.mrb[74].mxu0  ;;  %v2857_v24 = vpop.f32.mrb[74].mxu1 }
 0x817   : > { %v3007_v1 = vadd.f32 %v6245_v62, %v2696_v35  ;;  %v3009_v18 = vadd.f32 %v6248_v48, %v2857_v24  ;;  %v2698_v45 = vpop.f32.mrb[75].mxu0  ;;  %v2859_v2 = vpop.f32.mrb[75].mxu1 }
 0x818   : > { %v3008_v46 = vadd.f32 %v6253_v7, %v2698_v45  ;;  %v3010_v11 = vadd.f32 %v6256_v19, %v2859_v2 }
 0x819   : > { %3135 = vst [vmem:[%s6120_s27 + $0x160] sm:$0xff] %v3007_v1  ;;  %3137 = vst [vmem:[%s6120_s27 + $0x170] sm:$0xff] %v3009_v18 }
 0x81a   : > { %3136 = vst [vmem:[%s6120_s27 + $0x168] sm:$0xff] %v3008_v46  ;;  %3138 = vst [vmem:[%s6120_s27 + $0x178] sm:$0xff] %v3010_v11  ;;  %v2702_v40 = vpop.f32.mrb[76].mxu0  ;;  %v2863_v38 = vpop.f32.mrb[76].mxu1 }
 0x81b   : > { %v3015_v4 = vadd.f32 %v6245_v62, %v2702_v40  ;;  %v3017_v28 = vadd.f32 %v6248_v48, %v2863_v38  ;;  %v2704_v34 = vpop.f32.mrb[77].mxu0  ;;  %v2865_v59 = vpop.f32.mrb[77].mxu1 }
 0x81c   : > { %v3016_v42 = vadd.f32 %v6253_v7, %v2704_v34  ;;  %v3018_v39 = vadd.f32 %v6256_v19, %v2865_v59 }
 0x81d   : > { %3143 = vst [vmem:[%s6120_s27 + $0x1a0] sm:$0xff] %v3015_v4  ;;  %3145 = vst [vmem:[%s6120_s27 + $0x1b0] sm:$0xff] %v3017_v28 }
 0x81e   : > { %3144 = vst [vmem:[%s6120_s27 + $0x1a8] sm:$0xff] %v3016_v42  ;;  %3146 = vst [vmem:[%s6120_s27 + $0x1b8] sm:$0xff] %v3018_v39  ;;  %v2708_v60 = vpop.f32.mrb[78].mxu0  ;;  %v2869_v32 = vpop.f32.mrb[78].mxu1 }
 0x81f   : > { %v3023_v6 = vadd.f32 %v6245_v62, %v2708_v60  ;;  %v3025_v30 = vadd.f32 %v6248_v48, %v2869_v32  ;;  %v2710_v21 = vpop.f32.mrb[79].mxu0  ;;  %v2871_v57 = vpop.f32.mrb[79].mxu1 }
 0x820   : > { %v3024_v3 = vadd.f32 %v6253_v7, %v2710_v21  ;;  %v3026_v52 = vadd.f32 %v6256_v19, %v2871_v57 }
 0x821   : > { %3151 = vst [vmem:[%s6120_s27 + $0x1e0] sm:$0xff] %v3023_v6  ;;  %3153 = vst [vmem:[%s6120_s27 + $0x1f0] sm:$0xff] %v3025_v30 }
 0x822   : > { %3152 = vst [vmem:[%s6120_s27 + $0x1e8] sm:$0xff] %v3024_v3  ;;  %3154 = vst [vmem:[%s6120_s27 + $0x1f8] sm:$0xff] %v3026_v52  ;;  %v2714_v37 = vpop.f32.mrb[80].mxu0  ;;  %v2875_v54 = vpop.f32.mrb[80].mxu1 }
 0x823   : > { %v3031_v51 = vadd.f32 %v6245_v62, %v2714_v37  ;;  %v3033_v63 = vadd.f32 %v6248_v48, %v2875_v54  ;;  %v2716_v50 = vpop.f32.mrb[81].mxu0  ;;  %v2877_v26 = vpop.f32.mrb[81].mxu1 }
 0x824   : > { %v3032_v27 = vadd.f32 %v6253_v7, %v2716_v50  ;;  %v3034_v33 = vadd.f32 %v6256_v19, %v2877_v26 }
 0x825   : > { %3159 = vst [vmem:[%s6120_s27 + $0x220] sm:$0xff] %v3031_v51  ;;  %3161 = vst [vmem:[%s6120_s27 + $0x230] sm:$0xff] %v3033_v63 }
 0x826   : > { %3160 = vst [vmem:[%s6120_s27 + $0x228] sm:$0xff] %v3032_v27  ;;  %3162 = vst [vmem:[%s6120_s27 + $0x238] sm:$0xff] %v3034_v33  ;;  %v2720_v53 = vpop.f32.mrb[82].mxu0  ;;  %v2881_v29 = vpop.f32.mrb[82].mxu1 }
 0x827   : > { %v3039_v43 = vadd.f32 %v6245_v62, %v2720_v53  ;;  %v3041_v14 = vadd.f32 %v6248_v48, %v2881_v29  ;;  %v2722_v36 = vpop.f32.mrb[83].mxu0  ;;  %v2883_v49 = vpop.f32.mrb[83].mxu1 }
 0x828   : > { %v3040_v25 = vadd.f32 %v6253_v7, %v2722_v36  ;;  %v3042_v20 = vadd.f32 %v6256_v19, %v2883_v49 }
 0x829   : > { %3167 = vst [vmem:[%s6120_s27 + $0x260] sm:$0xff] %v3039_v43  ;;  %3169 = vst [vmem:[%s6120_s27 + $0x270] sm:$0xff] %v3041_v14 }
 0x82a   : > { %3168 = vst [vmem:[%s6120_s27 + $0x268] sm:$0xff] %v3040_v25  ;;  %3170 = vst [vmem:[%s6120_s27 + $0x278] sm:$0xff] %v3042_v20  ;;  %v2726_v44 = vpop.f32.mrb[84].mxu0  ;;  %v2887_v23 = vpop.f32.mrb[84].mxu1 }
 0x82b   : > { %v3047_v56 = vadd.f32 %v6245_v62, %v2726_v44  ;;  %v3049_v9 = vadd.f32 %v6248_v48, %v2887_v23  ;;  %v2728_v58 = vpop.f32.mrb[85].mxu0  ;;  %v2889_v15 = vpop.f32.mrb[85].mxu1 }
 0x82c   : > { %v3048_v16 = vadd.f32 %v6253_v7, %v2728_v58  ;;  %v3050_v41 = vadd.f32 %v6256_v19, %v2889_v15 }
 0x82d   : > { %3175 = vst [vmem:[%s6120_s27 + $0x2a0] sm:$0xff] %v3047_v56  ;;  %3177 = vst [vmem:[%s6120_s27 + $0x2b0] sm:$0xff] %v3049_v9 }
 0x82e   : > { %3176 = vst [vmem:[%s6120_s27 + $0x2a8] sm:$0xff] %v3048_v16  ;;  %3178 = vst [vmem:[%s6120_s27 + $0x2b8] sm:$0xff] %v3050_v41  ;;  %v2732_v8 = vpop.f32.mrb[86].mxu0  ;;  %v2893_v17 = vpop.f32.mrb[86].mxu1 }
 0x82f   : > { %v3055_v55 = vadd.f32 %v6245_v62, %v2732_v8  ;;  %v3057_v0 = vadd.f32 %v6248_v48, %v2893_v17  ;;  %v2734_v22 = vpop.f32.mrb[87].mxu0  ;;  %v2895_v10 = vpop.f32.mrb[87].mxu1 }
 0x830   : > { %v3056_v5 = vadd.f32 %v6253_v7, %v2734_v22  ;;  %v3058_v61 = vadd.f32 %v6256_v19, %v2895_v10 }
 0x831   : > { %3183 = vst [vmem:[%s6120_s27 + $0x2e0] sm:$0xff] %v3055_v55  ;;  %3185 = vst [vmem:[%s6120_s27 + $0x2f0] sm:$0xff] %v3057_v0 }
 0x832   : > { %3184 = vst [vmem:[%s6120_s27 + $0x2e8] sm:$0xff] %v3056_v5  ;;  %3186 = vst [vmem:[%s6120_s27 + $0x2f8] sm:$0xff] %v3058_v61  ;;  %v2738_v12 = vpop.f32.mrb[88].mxu0  ;;  %v2899_v13 = vpop.f32.mrb[88].mxu1 }
 0x833   : > { %v3063_v31 = vadd.f32 %v6245_v62, %v2738_v12  ;;  %v3065_v47 = vadd.f32 %v6248_v48, %v2899_v13  ;;  %v2740_v35 = vpop.f32.mrb[89].mxu0  ;;  %v2901_v24 = vpop.f32.mrb[89].mxu1 }
 0x834   : > { %v3064_v1 = vadd.f32 %v6253_v7, %v2740_v35  ;;  %v3066_v18 = vadd.f32 %v6256_v19, %v2901_v24 }
 0x835   : > { %3191 = vst [vmem:[%s6120_s27 + $0x320] sm:$0xff] %v3063_v31  ;;  %3193 = vst [vmem:[%s6120_s27 + $0x330] sm:$0xff] %v3065_v47 }
 0x836   : > { %3192 = vst [vmem:[%s6120_s27 + $0x328] sm:$0xff] %v3064_v1  ;;  %3194 = vst [vmem:[%s6120_s27 + $0x338] sm:$0xff] %v3066_v18  ;;  %v2744_v45 = vpop.f32.mrb[90].mxu0  ;;  %v2905_v2 = vpop.f32.mrb[90].mxu1 }
 0x837   : > { %v3071_v46 = vadd.f32 %v6245_v62, %v2744_v45  ;;  %v3073_v11 = vadd.f32 %v6248_v48, %v2905_v2  ;;  %v2746_v40 = vpop.f32.mrb[91].mxu0  ;;  %v2907_v38 = vpop.f32.mrb[91].mxu1 }
 0x838   : > { %v3072_v4 = vadd.f32 %v6253_v7, %v2746_v40  ;;  %v3074_v28 = vadd.f32 %v6256_v19, %v2907_v38 }
 0x839   : > { %3199 = vst [vmem:[%s6120_s27 + $0x360] sm:$0xff] %v3071_v46  ;;  %3201 = vst [vmem:[%s6120_s27 + $0x370] sm:$0xff] %v3073_v11 }
 0x83a   : > { %3200 = vst [vmem:[%s6120_s27 + $0x368] sm:$0xff] %v3072_v4  ;;  %3202 = vst [vmem:[%s6120_s27 + $0x378] sm:$0xff] %v3074_v28  ;;  %v2750_v34 = vpop.f32.mrb[92].mxu0  ;;  %v2911_v59 = vpop.f32.mrb[92].mxu1 }
 0x83b   : > { %v3079_v42 = vadd.f32 %v6245_v62, %v2750_v34  ;;  %v3081_v39 = vadd.f32 %v6248_v48, %v2911_v59  ;;  %v2752_v60 = vpop.f32.mrb[93].mxu0  ;;  %v2913_v32 = vpop.f32.mrb[93].mxu1 }
 0x83c   : > { %v3080_v6 = vadd.f32 %v6253_v7, %v2752_v60  ;;  %v3082_v30 = vadd.f32 %v6256_v19, %v2913_v32 }
 0x83d   : > { %3207 = vst [vmem:[%s6120_s27 + $0x3a0] sm:$0xff] %v3079_v42  ;;  %3209 = vst [vmem:[%s6120_s27 + $0x3b0] sm:$0xff] %v3081_v39 }
 0x83e   : > { %3208 = vst [vmem:[%s6120_s27 + $0x3a8] sm:$0xff] %v3080_v6  ;;  %3210 = vst [vmem:[%s6120_s27 + $0x3b8] sm:$0xff] %v3082_v30  ;;  %v2756_v21 = vpop.f32.mrb[94].mxu0  ;;  %v2917_v57 = vpop.f32.mrb[94].mxu1 }
 0x83f   : > { %v3087_v3 = vadd.f32 %v6245_v62, %v2756_v21  ;;  %v3089_v52 = vadd.f32 %v6248_v48, %v2917_v57  ;;  %v2758_v37 = vpop.f32.mrb[95].mxu0  ;;  %v2919_v54 = vpop.f32.mrb[95].mxu1 }
 0x840   : > { %v3088_v51 = vadd.f32 %v6253_v7, %v2758_v37  ;;  %v3090_v63 = vadd.f32 %v6256_v19, %v2919_v54 }
 0x841   : > { %3215 = vst [vmem:[%s6120_s27 + $0x3e0] sm:$0xff] %v3087_v3  ;;  %3217 = vst [vmem:[%s6120_s27 + $0x3f0] sm:$0xff] %v3089_v52 }
 0x842   : > { %3216 = vst [vmem:[%s6120_s27 + $0x3e8] sm:$0xff] %v3088_v51  ;;  %3218 = vst [vmem:[%s6120_s27 + $0x3f8] sm:$0xff] %v3090_v63 }
 0x843   : > { %4514 = shalt.err (!%p4511_p3)
}
 0x844   : > { %s4515_s11 = scalar_lea.hbm %s6389_s5, 16384  ;;  %s4519_s20 = scalar_lea.hbm %s6446_s3, 32768 }
 0x845   : > { %p4516_p4 = scmp.ne.s32.totalorder %s6389_s5, %s4515_s11  ;;  %p4520_p9 = scmp.lt.u32.totalorder %s6389_s5, %s6446_s3 }
 0x846   : > { %p4521_p10 = scmp.lt.u32.totalorder %s4519_s20, %s4515_s11  ;;  %p4523_p12 = scmp.lt.u32.totalorder %s4515_s11, %s6389_s5 }
 0x847   : > { %p4517_p7 = pnand %p4516_p4, %p4629_p5 }
 0x848   : > { %p4522_p11 = por %p4521_p10, %p4520_p9 }
 0x849   : > { %p4518_p8 = pneg %p4517_p7 }
 0x84a   : > { %p4524_p13 = por %p4523_p12, %p4522_p11 }
 0x84c   : > { %p4525_p0 = pnand %p4524_p13, %p4518_p8 }
 0x84e   : > { %4528 = shalt.err (!%p4525_p0)
}
 0x84f   : > { %s4570_s26 = smov 1024  }
 0x850   : > { %4205 = dma.vmem_to_hbm [thread:$0]  (%p4629_p5), %s6393_s30, 16384, %s6389_s5, %s6401_s6, %s4570_s26, %s4570_s26, %s4565_s29  }
 0x851 PF: > { %p4211_p1 = scmp.ge.s32.totalorder %s4563_s15, 2  ;;  %s3248_s27 = sand.u32 1, %s4551_s12  }
 0x852   : > { %s3249_s28 = scalar_lea.sflag [#allocation3], %s3248_s27 }
 0x853   : > { %p4208_p2 = pnand %p4211_p1, %p4633_p6 }
 0x855   : > { %4546 = dma.done.wait (!%p4208_p2), %s3249_s28, 16384  }
 0x856   : > { %4548 = vsyncadd (!%p4208_p2), %s3249_s28, 4294950912  ;;  %p13_p3 = scmp.ge.s32.totalorder %s4616_s18, 4   ;;  %s6507_s12 = smov %s4555_s13 }
 0x857   : > { %s6508_s13 = smov %s4559_s14  ;;  %s6509_s14 = smov %s4627_s21 }
 0x858   : > { %s6510_s15 = smov %s4616_s18  ;;  %15 = sbr.rel (!%p13_p3) target bundleno = 3 (0x3), region = 67 }
 0x85f   :  { %3254 = vsyncpa [#allocation3], 1 }
 0x860   :  { %3256 = vsyncpa [#allocation3 + $0x1], 1 }

</bundles_post_ra>
